<compile_context>
chip_gen: v7x
topology: tpu7x:2x2x1
jax: 0.10.0
libtpu: 0.0.40
codegen_flags: <defaults>
</compile_context>

<pallas_src>
import functools

import numpy as np
import jax
import jax.numpy as jnp
from jax import lax
from jax.experimental import pallas as pl
from jax.experimental.pallas import tpu as pltpu


# ----------------------------------------------------------------------------
# Fused Pallas kernels (single invocation, no grid; everything resident in VMEM)
# ----------------------------------------------------------------------------
def _feats_kernel(x2_ref, g_ref, wf_ref, bf_ref, out_ref):
    """feats = relu(conv3x3/s2(x) + b), batch folded into the sublane axis.

    x2  : (N*Cin, H*W)     input image, rows = (batch, channel)
    g   : (9, H*W, FH*FW)  constant one-hot im2col/stride/pad gather, one per tap
    wf  : (9, N*Cf, N*Cin) per-tap conv weights, block-diagonal over batch
    bf  : (N*Cf, 1)
    out : (N*Cf, FH*FW)
    """
    x2 = x2_ref[...]
    acc = None
    for t in range(g_ref.shape[0]):                       # static 9-tap loop
        xt = jnp.dot(x2, g_ref[t], preferred_element_type=jnp.float32)    # (N*Cin, FH*FW)
        ft = jnp.dot(wf_ref[t], xt, preferred_element_type=jnp.float32)   # (N*Cf, FH*FW)
        acc = ft if acc is None else acc + ft
    out_ref[...] = jnp.maximum(acc + bf_ref[...], 0.0)


def _cls_kernel(x2_ref, g_ref, wf_ref, bf_ref, wc_ref, bc_ref, wbT_ref, out_ref):
    """Fused conv3x3/s2 + ReLU -> merged 1x1 classifier(s) -> bilinear upsample.

    wc  : (N*nc_pad, N*Cf)   merged + sublane-padded classifier weights (block-diag over batch)
    bc  : (N*nc_pad, 1)
    wbT : (FH*FW, H*W)       Kronecker bilinear operator (align_corners=False)
    out : (N*nc_pad, H*W)    lane-dense (>=128 lanes) unmasked store
    """
    x2 = x2_ref[...]
    acc = None
    for t in range(g_ref.shape[0]):
        xt = jnp.dot(x2, g_ref[t], preferred_element_type=jnp.float32)
        ft = jnp.dot(wf_ref[t], xt, preferred_element_type=jnp.float32)
        acc = ft if acc is None else acc + ft
    feats = jnp.maximum(acc + bf_ref[...], 0.0)                                   # (N*Cf, FH*FW)
    logits = jnp.dot(wc_ref[...], feats, preferred_element_type=jnp.float32) + bc_ref[...]
    out_ref[...] = jnp.dot(logits, wbT_ref[...], preferred_element_type=jnp.float32)


def _vmem_spec():
    return pl.BlockSpec(memory_space=pltpu.MemorySpace.VMEM)


def feats_pallas(x2, g, wf_bd, bf_bd):
    ncf, fhw = wf_bd.shape[1], g.shape[2]
    return pl.pallas_call(
        _feats_kernel,
        out_shape=jax.ShapeDtypeStruct((ncf, fhw), jnp.float32),
        in_specs=[_vmem_spec() for _ in range(4)],
        out_specs=_vmem_spec(),
    )(x2, g, wf_bd, bf_bd)


def cls_pallas(x2, g, wf_bd, bf_bd, wc_bd, bc_bd, wbT):
    nncp, hw = wc_bd.shape[0], wbT.shape[1]
    return pl.pallas_call(
        _cls_kernel,
        out_shape=jax.ShapeDtypeStruct((nncp, hw), jnp.float32),
        in_specs=[_vmem_spec() for _ in range(7)],
        out_specs=_vmem_spec(),
    )(x2, g, wf_bd, bf_bd, wc_bd, bc_bd, wbT)


# ----------------------------------------------------------------------------
# One-time parameter packing (hoisted out of the per-call jit entirely).
# Builds the constant gather / upsample operators and block-diagonal weights.
# ----------------------------------------------------------------------------
def _bilinear_matrix_np(in_size, out_size):
    """PyTorch F.interpolate(mode='bilinear', align_corners=False) as a matrix."""
    dst = np.arange(out_size, dtype=np.float64)
    src = (dst + 0.5) * (in_size / out_size) - 0.5
    src = np.maximum(src, 0.0)                               # PyTorch clamps negative coords
    i0 = np.minimum(np.floor(src).astype(np.int64), in_size - 1)
    i1 = np.minimum(i0 + 1, in_size - 1)
    w1 = src - i0
    mat = np.zeros((out_size, in_size), dtype=np.float64)
    mat[np.arange(out_size), i0] += 1.0 - w1
    mat[np.arange(out_size), i1] += w1
    return mat


def pack_params(params, *, n, cin, h, w, kh=3, kw=3, stride=2, pad=1):
    cf = int(params["w_feat"].shape[0])
    fh = (h + 2 * pad - kh) // stride + 1
    fw = (w + 2 * pad - kw) // stride + 1

    # One-hot gather operators: im2col + stride + zero-padding as 9 constant matmuls.
    g = np.zeros((kh * kw, h * w, fh * fw), np.float32)
    for t in range(kh * kw):
        dh, dw = divmod(t, kw)
        for oh in range(fh):
            ih = stride * oh + dh - pad
            if not (0 <= ih < h):
                continue
            for ow in range(fw):
                iw = stride * ow + dw - pad
                if not (0 <= iw < w):
                    continue
                g[t, ih * w + iw, oh * fw + ow] = 1.0

    eye_n = np.eye(n, dtype=np.float32)
    wfeat = np.asarray(params["w_feat"], np.float32)                      # (Cf, Cin, 3, 3)
    wf_bd = np.stack([np.kron(eye_n, wfeat[:, :, t // kw, t % kw])
                      for t in range(kh * kw)])                           # (9, N*Cf, N*Cin)
    bf_bd = np.tile(np.asarray(params["b_feat"], np.float32).reshape(cf, 1), (n, 1))

    # Kronecker bilinear upsample operator: (FH*FW, H*W)
    wbT = np.kron(_bilinear_matrix_np(fh, h), _bilinear_matrix_np(fw, w)).T.astype(np.float32)

    def _cls(keys):
        wc = np.concatenate([np.asarray(params[f"w_cl{k}"], np.float32) for k in keys], 0)
        bc = np.concatenate([np.asarray(params[f"b_cl{k}"], np.float32) for k in keys], 0)
        nc = int(wc.shape[0])
        nc_pad = ((nc + 7) // 8) * 8                     # full-sublane tiles -> unmasked store
        wc_p = np.zeros((nc_pad, cf), np.float32); wc_p[:nc] = wc
        bc_p = np.zeros((nc_pad, 1), np.float32);  bc_p[:nc, 0] = bc
        return dict(wc_bd=jnp.asarray(np.kron(eye_n, wc_p)),              # (N*nc_pad, N*Cf)
                    bc_bd=jnp.asarray(np.tile(bc_p, (n, 1))),             # (N*nc_pad, 1)
                    nc=nc)

    return dict(
        g=jnp.asarray(g), wf_bd=jnp.asarray(wf_bd), bf_bd=jnp.asarray(bf_bd),
        wbT=jnp.asarray(wbT),
        cls={"1": _cls(("1",)), "2": _cls(("2",)), "12": _cls(("1", "2"))},
    )


# ----------------------------------------------------------------------------
# Jitted forwards (per-call graph: bitcast reshape -> pallas_call -> bitcast/slice)
# ----------------------------------------------------------------------------
@jax.jit
def _forward_feats(x, g, wf_bd, bf_bd):
    n, cin, h, w = x.shape
    fh = (h + 2 - 3) // 2 + 1
    fw = (w + 2 - 3) // 2 + 1
    cf = wf_bd.shape[1] // n
    x2 = x.reshape(n * cin, h * w)                         # free bitcast, batch -> sublanes
    feats = feats_pallas(x2, g, wf_bd, bf_bd)              # (N*Cf, FH*FW)
    return feats.reshape(n, cf, fh, fw)                    # free bitcast -> NCHW


@functools.partial(jax.jit, static_argnames=("nc", "split"))
def _forward_cls(x, g, wf_bd, bf_bd, wc_bd, bc_bd, wbT, *, nc, split):
    n, cin, h, w = x.shape
    nc_pad = wc_bd.shape[0] // n
    x2 = x.reshape(n * cin, h * w)                         # free bitcast
    out = cls_pallas(x2, g, wf_bd, bf_bd, wc_bd, bc_bd, wbT)   # (N*nc_pad, H*W)
    out = out.reshape(n, nc_pad, h, w)                     # free bitcast -> NCHW
    if split:
        half = nc // 2
        return out[:, :half], out[:, half:nc]
    return out[:, :nc]


def mcd_wrapper_forward(x, packed, classifier1=False, classifier2=False):
    """McdWrapper.forward: feats | cls1 | cls2 | (cls1, cls2)."""
    if not (classifier1 or classifier2):
        return _forward_feats(x, packed["g"], packed["wf_bd"], packed["bf_bd"])
    key = ("1" if classifier1 else "") + ("2" if classifier2 else "")
    c = packed["cls"][key]
    return _forward_cls(x, packed["g"], packed["wf_bd"], packed["bf_bd"],
                        c["wc_bd"], c["bc_bd"], packed["wbT"],
                        nc=c["nc"], split=(classifier1 and classifier2))


# ----------------------------------------------------------------------------
# Pure-JAX reference (correctness check only)
# ----------------------------------------------------------------------------
def reference_forward(x, params):
    h, w = x.shape[-2:]
    feats = lax.conv_general_dilated(
        x, params["w_feat"], window_strides=(2, 2), padding=((1, 1), (1, 1)),
        dimension_numbers=("NCHW", "OIHW", "NCHW"))
    feats = jax.nn.relu(feats + params["b_feat"][None, :, None, None])
    fh, fw = feats.shape[-2:]
    wh = jnp.asarray(_bilinear_matrix_np(fh, h), jnp.float32)
    ww = jnp.asarray(_bilinear_matrix_np(fw, w), jnp.float32)

    def cls(wgt, b):
        logits = jnp.einsum("kc,nchw->nkhw", wgt, feats) + b[None, :, None, None]
        tmp = jnp.einsum("ph,nkhw->nkpw", wh, logits)
        return jnp.einsum("qw,nkpw->nkpq", ww, tmp)

    return feats, cls(params["w_cl1"], params["b_cl1"]), cls(params["w_cl2"], params["b_cl2"])


# ----------------------------------------------------------------------------
if __name__ == "__main__":
    N, CIN, H, W = 2, 4, 16, 16
    CF, NUM_CLASSES = 32, 6

    # deterministic synthetic parameters (classifier2 = deepcopy(classifier1))
    key = jax.random.PRNGKey(0)
    kx, k1, k2, k3, k4 = jax.random.split(key, 5)
    w_feat = 0.1 * jax.random.normal(k1, (CF, CIN, 3, 3), jnp.float32)
    b_feat = 0.05 * jax.random.normal(k2, (CF,), jnp.float32)
    w_cl1 = 0.1 * jax.random.normal(k3, (NUM_CLASSES, CF), jnp.float32)
    b_cl1 = 0.05 * jax.random.normal(k4, (NUM_CLASSES,), jnp.float32)
    params = {
        "w_feat": w_feat, "b_feat": b_feat,
        "w_cl1": w_cl1, "b_cl1": b_cl1,
        "w_cl2": w_cl1, "b_cl2": b_cl1,   # copy.deepcopy -> identical initial weights
    }

    x = jax.random.normal(kx, (N, CIN, H, W), jnp.float32)

    # one-time weight packing (outside the per-call jit)
    packed = pack_params(params, n=N, cin=CIN, h=H, w=W)

    # default path: feats only
    feats = mcd_wrapper_forward(x, packed)
    # both classifiers (single fused kernel launch)
    out1, out2 = mcd_wrapper_forward(x, packed, classifier1=True, classifier2=True)
    # single-classifier paths
    out1_only = mcd_wrapper_forward(x, packed, classifier1=True)
    out2_only = mcd_wrapper_forward(x, packed, classifier2=True)
    jax.block_until_ready((feats, out1, out2, out1_only, out2_only))

    # correctness check against pure-JAX reference
    feats_ref, out1_ref, out2_ref = reference_forward(x, params)
    assert feats.shape == (N, CF, H // 2, W // 2)
    assert out1.shape == (N, NUM_CLASSES, H, W) and out2.shape == (N, NUM_CLASSES, H, W)
    assert jnp.allclose(feats, feats_ref, atol=1e-4, rtol=1e-4)
    assert jnp.allclose(out1, out1_ref, atol=1e-4, rtol=1e-4)
    assert jnp.allclose(out2, out2_ref, atol=1e-4, rtol=1e-4)
    assert jnp.allclose(out1_only, out1_ref, atol=1e-4, rtol=1e-4)
    assert jnp.allclose(out2_only, out2_ref, atol=1e-4, rtol=1e-4)

    print("KERNEL_OK")
</pallas_src>

<mosaic_0001>
module attributes {stable_mosaic.version = 11 : i64} {
  func.func @_feats_kernel(%arg0: memref<8x256xf32, #tpu.memory_space<vmem>>, %arg1: memref<9x256x64xf32, #tpu.memory_space<vmem>>, %arg2: memref<9x64x8xf32, #tpu.memory_space<vmem>>, %arg3: memref<64x1xf32, #tpu.memory_space<vmem>>, %arg4: memref<64x64xf32, #tpu.memory_space<vmem>>) attributes {dimension_semantics = [], scalar_prefetch = 0 : i64, scratch_operands = 0 : i64, tpu.core_type = #tpu.core_type<tc>} {
    %c0 = arith.constant 0 : index
    %c0_0 = arith.constant 0 : index
    %0 = vector.load %arg0[%c0, %c0_0] : memref<8x256xf32, #tpu.memory_space<vmem>>, vector<8x256xf32>
    %c0_1 = arith.constant 0 : index
    %c0_2 = arith.constant 0 : index
    %c0_3 = arith.constant 0 : index
    %1 = vector.load %arg1[%c0_1, %c0_2, %c0_3] : memref<9x256x64xf32, #tpu.memory_space<vmem>>, vector<1x256x64xf32>
    %2 = vector.shape_cast %1 : vector<1x256x64xf32> to vector<256x64xf32>
    %cst = arith.constant dense<0.000000e+00> : vector<8x64xf32>
    %3 = tpu.matmul %0, %2, %cst {dimension_numbers = #tpu.dot_dimension_numbers<[1], [0], [0], [1], [0, 0, 1, 1], [], []>} : vector<8x256xf32>, vector<256x64xf32>, vector<8x64xf32> -> vector<8x64xf32>
    %c0_4 = arith.constant 0 : index
    %c0_5 = arith.constant 0 : index
    %c0_6 = arith.constant 0 : index
    %4 = vector.load %arg2[%c0_4, %c0_5, %c0_6] : memref<9x64x8xf32, #tpu.memory_space<vmem>>, vector<1x64x8xf32>
    %5 = vector.shape_cast %4 : vector<1x64x8xf32> to vector<64x8xf32>
    %cst_7 = arith.constant dense<0.000000e+00> : vector<64x64xf32>
    %6 = tpu.matmul %5, %3, %cst_7 {dimension_numbers = #tpu.dot_dimension_numbers<[1], [0], [0], [1], [0, 0, 1, 1], [], []>} : vector<64x8xf32>, vector<8x64xf32>, vector<64x64xf32> -> vector<64x64xf32>
    %c1 = arith.constant 1 : index
    %c0_8 = arith.constant 0 : index
    %c0_9 = arith.constant 0 : index
    %7 = vector.load %arg1[%c1, %c0_8, %c0_9] : memref<9x256x64xf32, #tpu.memory_space<vmem>>, vector<1x256x64xf32>
    %8 = vector.shape_cast %7 : vector<1x256x64xf32> to vector<256x64xf32>
    %cst_10 = arith.constant dense<0.000000e+00> : vector<8x64xf32>
    %9 = tpu.matmul %0, %8, %cst_10 {dimension_numbers = #tpu.dot_dimension_numbers<[1], [0], [0], [1], [0, 0, 1, 1], [], []>} : vector<8x256xf32>, vector<256x64xf32>, vector<8x64xf32> -> vector<8x64xf32>
    %c1_11 = arith.constant 1 : index
    %c0_12 = arith.constant 0 : index
    %c0_13 = arith.constant 0 : index
    %10 = vector.load %arg2[%c1_11, %c0_12, %c0_13] : memref<9x64x8xf32, #tpu.memory_space<vmem>>, vector<1x64x8xf32>
    %11 = vector.shape_cast %10 : vector<1x64x8xf32> to vector<64x8xf32>
    %cst_14 = arith.constant dense<0.000000e+00> : vector<64x64xf32>
    %12 = tpu.matmul %11, %9, %cst_14 {dimension_numbers = #tpu.dot_dimension_numbers<[1], [0], [0], [1], [0, 0, 1, 1], [], []>} : vector<64x8xf32>, vector<8x64xf32>, vector<64x64xf32> -> vector<64x64xf32>
    %13 = arith.addf %6, %12 : vector<64x64xf32>
    %c2 = arith.constant 2 : index
    %c0_15 = arith.constant 0 : index
    %c0_16 = arith.constant 0 : index
    %14 = vector.load %arg1[%c2, %c0_15, %c0_16] : memref<9x256x64xf32, #tpu.memory_space<vmem>>, vector<1x256x64xf32>
    %15 = vector.shape_cast %14 : vector<1x256x64xf32> to vector<256x64xf32>
    %cst_17 = arith.constant dense<0.000000e+00> : vector<8x64xf32>
    %16 = tpu.matmul %0, %15, %cst_17 {dimension_numbers = #tpu.dot_dimension_numbers<[1], [0], [0], [1], [0, 0, 1, 1], [], []>} : vector<8x256xf32>, vector<256x64xf32>, vector<8x64xf32> -> vector<8x64xf32>
    %c2_18 = arith.constant 2 : index
    %c0_19 = arith.constant 0 : index
    %c0_20 = arith.constant 0 : index
    %17 = vector.load %arg2[%c2_18, %c0_19, %c0_20] : memref<9x64x8xf32, #tpu.memory_space<vmem>>, vector<1x64x8xf32>
    %18 = vector.shape_cast %17 : vector<1x64x8xf32> to vector<64x8xf32>
    %cst_21 = arith.constant dense<0.000000e+00> : vector<64x64xf32>
    %19 = tpu.matmul %18, %16, %cst_21 {dimension_numbers = #tpu.dot_dimension_numbers<[1], [0], [0], [1], [0, 0, 1, 1], [], []>} : vector<64x8xf32>, vector<8x64xf32>, vector<64x64xf32> -> vector<64x64xf32>
    %20 = arith.addf %13, %19 : vector<64x64xf32>
    %c3 = arith.constant 3 : index
    %c0_22 = arith.constant 0 : index
    %c0_23 = arith.constant 0 : index
    %21 = vector.load %arg1[%c3, %c0_22, %c0_23] : memref<9x256x64xf32, #tpu.memory_space<vmem>>, vector<1x256x64xf32>
    %22 = vector.shape_cast %21 : vector<1x256x64xf32> to vector<256x64xf32>
    %cst_24 = arith.constant dense<0.000000e+00> : vector<8x64xf32>
    %23 = tpu.matmul %0, %22, %cst_24 {dimension_numbers = #tpu.dot_dimension_numbers<[1], [0], [0], [1], [0, 0, 1, 1], [], []>} : vector<8x256xf32>, vector<256x64xf32>, vector<8x64xf32> -> vector<8x64xf32>
    %c3_25 = arith.constant 3 : index
    %c0_26 = arith.constant 0 : index
    %c0_27 = arith.constant 0 : index
    %24 = vector.load %arg2[%c3_25, %c0_26, %c0_27] : memref<9x64x8xf32, #tpu.memory_space<vmem>>, vector<1x64x8xf32>
    %25 = vector.shape_cast %24 : vector<1x64x8xf32> to vector<64x8xf32>
    %cst_28 = arith.constant dense<0.000000e+00> : vector<64x64xf32>
    %26 = tpu.matmul %25, %23, %cst_28 {dimension_numbers = #tpu.dot_dimension_numbers<[1], [0], [0], [1], [0, 0, 1, 1], [], []>} : vector<64x8xf32>, vector<8x64xf32>, vector<64x64xf32> -> vector<64x64xf32>
    %27 = arith.addf %20, %26 : vector<64x64xf32>
    %c4 = arith.constant 4 : index
    %c0_29 = arith.constant 0 : index
    %c0_30 = arith.constant 0 : index
    %28 = vector.load %arg1[%c4, %c0_29, %c0_30] : memref<9x256x64xf32, #tpu.memory_space<vmem>>, vector<1x256x64xf32>
    %29 = vector.shape_cast %28 : vector<1x256x64xf32> to vector<256x64xf32>
    %cst_31 = arith.constant dense<0.000000e+00> : vector<8x64xf32>
    %30 = tpu.matmul %0, %29, %cst_31 {dimension_numbers = #tpu.dot_dimension_numbers<[1], [0], [0], [1], [0, 0, 1, 1], [], []>} : vector<8x256xf32>, vector<256x64xf32>, vector<8x64xf32> -> vector<8x64xf32>
    %c4_32 = arith.constant 4 : index
    %c0_33 = arith.constant 0 : index
    %c0_34 = arith.constant 0 : index
    %31 = vector.load %arg2[%c4_32, %c0_33, %c0_34] : memref<9x64x8xf32, #tpu.memory_space<vmem>>, vector<1x64x8xf32>
    %32 = vector.shape_cast %31 : vector<1x64x8xf32> to vector<64x8xf32>
    %cst_35 = arith.constant dense<0.000000e+00> : vector<64x64xf32>
    %33 = tpu.matmul %32, %30, %cst_35 {dimension_numbers = #tpu.dot_dimension_numbers<[1], [0], [0], [1], [0, 0, 1, 1], [], []>} : vector<64x8xf32>, vector<8x64xf32>, vector<64x64xf32> -> vector<64x64xf32>
    %34 = arith.addf %27, %33 : vector<64x64xf32>
    %c5 = arith.constant 5 : index
    %c0_36 = arith.constant 0 : index
    %c0_37 = arith.constant 0 : index
    %35 = vector.load %arg1[%c5, %c0_36, %c0_37] : memref<9x256x64xf32, #tpu.memory_space<vmem>>, vector<1x256x64xf32>
    %36 = vector.shape_cast %35 : vector<1x256x64xf32> to vector<256x64xf32>
    %cst_38 = arith.constant dense<0.000000e+00> : vector<8x64xf32>
    %37 = tpu.matmul %0, %36, %cst_38 {dimension_numbers = #tpu.dot_dimension_numbers<[1], [0], [0], [1], [0, 0, 1, 1], [], []>} : vector<8x256xf32>, vector<256x64xf32>, vector<8x64xf32> -> vector<8x64xf32>
    %c5_39 = arith.constant 5 : index
    %c0_40 = arith.constant 0 : index
    %c0_41 = arith.constant 0 : index
    %38 = vector.load %arg2[%c5_39, %c0_40, %c0_41] : memref<9x64x8xf32, #tpu.memory_space<vmem>>, vector<1x64x8xf32>
    %39 = vector.shape_cast %38 : vector<1x64x8xf32> to vector<64x8xf32>
    %cst_42 = arith.constant dense<0.000000e+00> : vector<64x64xf32>
    %40 = tpu.matmul %39, %37, %cst_42 {dimension_numbers = #tpu.dot_dimension_numbers<[1], [0], [0], [1], [0, 0, 1, 1], [], []>} : vector<64x8xf32>, vector<8x64xf32>, vector<64x64xf32> -> vector<64x64xf32>
    %41 = arith.addf %34, %40 : vector<64x64xf32>
    %c6 = arith.constant 6 : index
    %c0_43 = arith.constant 0 : index
    %c0_44 = arith.constant 0 : index
    %42 = vector.load %arg1[%c6, %c0_43, %c0_44] : memref<9x256x64xf32, #tpu.memory_space<vmem>>, vector<1x256x64xf32>
    %43 = vector.shape_cast %42 : vector<1x256x64xf32> to vector<256x64xf32>
    %cst_45 = arith.constant dense<0.000000e+00> : vector<8x64xf32>
    %44 = tpu.matmul %0, %43, %cst_45 {dimension_numbers = #tpu.dot_dimension_numbers<[1], [0], [0], [1], [0, 0, 1, 1], [], []>} : vector<8x256xf32>, vector<256x64xf32>, vector<8x64xf32> -> vector<8x64xf32>
    %c6_46 = arith.constant 6 : index
    %c0_47 = arith.constant 0 : index
    %c0_48 = arith.constant 0 : index
    %45 = vector.load %arg2[%c6_46, %c0_47, %c0_48] : memref<9x64x8xf32, #tpu.memory_space<vmem>>, vector<1x64x8xf32>
    %46 = vector.shape_cast %45 : vector<1x64x8xf32> to vector<64x8xf32>
    %cst_49 = arith.constant dense<0.000000e+00> : vector<64x64xf32>
    %47 = tpu.matmul %46, %44, %cst_49 {dimension_numbers = #tpu.dot_dimension_numbers<[1], [0], [0], [1], [0, 0, 1, 1], [], []>} : vector<64x8xf32>, vector<8x64xf32>, vector<64x64xf32> -> vector<64x64xf32>
    %48 = arith.addf %41, %47 : vector<64x64xf32>
    %c7 = arith.constant 7 : index
    %c0_50 = arith.constant 0 : index
    %c0_51 = arith.constant 0 : index
    %49 = vector.load %arg1[%c7, %c0_50, %c0_51] : memref<9x256x64xf32, #tpu.memory_space<vmem>>, vector<1x256x64xf32>
    %50 = vector.shape_cast %49 : vector<1x256x64xf32> to vector<256x64xf32>
    %cst_52 = arith.constant dense<0.000000e+00> : vector<8x64xf32>
    %51 = tpu.matmul %0, %50, %cst_52 {dimension_numbers = #tpu.dot_dimension_numbers<[1], [0], [0], [1], [0, 0, 1, 1], [], []>} : vector<8x256xf32>, vector<256x64xf32>, vector<8x64xf32> -> vector<8x64xf32>
    %c7_53 = arith.constant 7 : index
    %c0_54 = arith.constant 0 : index
    %c0_55 = arith.constant 0 : index
    %52 = vector.load %arg2[%c7_53, %c0_54, %c0_55] : memref<9x64x8xf32, #tpu.memory_space<vmem>>, vector<1x64x8xf32>
    %53 = vector.shape_cast %52 : vector<1x64x8xf32> to vector<64x8xf32>
    %cst_56 = arith.constant dense<0.000000e+00> : vector<64x64xf32>
    %54 = tpu.matmul %53, %51, %cst_56 {dimension_numbers = #tpu.dot_dimension_numbers<[1], [0], [0], [1], [0, 0, 1, 1], [], []>} : vector<64x8xf32>, vector<8x64xf32>, vector<64x64xf32> -> vector<64x64xf32>
    %55 = arith.addf %48, %54 : vector<64x64xf32>
    %c8 = arith.constant 8 : index
    %c0_57 = arith.constant 0 : index
    %c0_58 = arith.constant 0 : index
    %56 = vector.load %arg1[%c8, %c0_57, %c0_58] : memref<9x256x64xf32, #tpu.memory_space<vmem>>, vector<1x256x64xf32>
    %57 = vector.shape_cast %56 : vector<1x256x64xf32> to vector<256x64xf32>
    %cst_59 = arith.constant dense<0.000000e+00> : vector<8x64xf32>
    %58 = tpu.matmul %0, %57, %cst_59 {dimension_numbers = #tpu.dot_dimension_numbers<[1], [0], [0], [1], [0, 0, 1, 1], [], []>} : vector<8x256xf32>, vector<256x64xf32>, vector<8x64xf32> -> vector<8x64xf32>
    %c8_60 = arith.constant 8 : index
    %c0_61 = arith.constant 0 : index
    %c0_62 = arith.constant 0 : index
    %59 = vector.load %arg2[%c8_60, %c0_61, %c0_62] : memref<9x64x8xf32, #tpu.memory_space<vmem>>, vector<1x64x8xf32>
    %60 = vector.shape_cast %59 : vector<1x64x8xf32> to vector<64x8xf32>
    %cst_63 = arith.constant dense<0.000000e+00> : vector<64x64xf32>
    %61 = tpu.matmul %60, %58, %cst_63 {dimension_numbers = #tpu.dot_dimension_numbers<[1], [0], [0], [1], [0, 0, 1, 1], [], []>} : vector<64x8xf32>, vector<8x64xf32>, vector<64x64xf32> -> vector<64x64xf32>
    %62 = arith.addf %55, %61 : vector<64x64xf32>
    %c0_64 = arith.constant 0 : index
    %c0_65 = arith.constant 0 : index
    %63 = vector.load %arg3[%c0_64, %c0_65] : memref<64x1xf32, #tpu.memory_space<vmem>>, vector<64x1xf32>
    %64 = vector.broadcast %63 : vector<64x1xf32> to vector<64x64xf32>
    %65 = arith.addf %62, %64 : vector<64x64xf32>
    %cst_66 = arith.constant 0.000000e+00 : f32
    %66 = vector.broadcast %cst_66 : f32 to vector<64x64xf32>
    %67 = arith.maximumf %65, %66 : vector<64x64xf32>
    %c0_67 = arith.constant 0 : index
    %c0_68 = arith.constant 0 : index
    %68 = vector.load %arg4[%c0_67, %c0_68] : memref<64x64xf32, #tpu.memory_space<vmem>>, vector<64x64xf32>
    tpu.vector_store %arg4[%c0_67, %c0_68], %67 {strides = array<i32>} : memref<64x64xf32, #tpu.memory_space<vmem>>, vector<64x64xf32>,
    return
  }
}

</mosaic_0001>

<bundles_post_ra>
// kernel: _forward_feats.1
= control target key start
LH: loop header
LB: loop body
LE: loop exit
PB: predicated region body
PF: predicated region fallthrough
CT: control target
= control target key end

     0   :  { %vm241_vm0 = vcmask 64512   ;;  %vm2307_vm1 = vcmask 523264   ;;  %s4892_s1 = inlined_call_operand.vmem [shape: f32[9,256,64], index: 1, kind: input, shape index: {}]   ;;  %s4893_s0 = inlined_call_operand.vmem [shape: f32[8,256], index: 0, kind: input, shape index: {}]   ;;  %s4894_s2 = inlined_call_operand.vmem [shape: f32[9,64,8], index: 2, kind: input, shape index: {}]   ;;  %s4895_s3 = inlined_call_operand.vmem [shape: f32[64,1], index: 3, kind: input, shape index: {}]   ;;  %s4896_s4 = inlined_call_operand.vmem [shape: f32[64,64], index: 4, kind: output, shape index: {}]  }
   0x1   :  { %v2336_v0 = vld [vmem:[%s4892_s1 + $0x180] sm:$0xff]  ;;  %v2337_v1 = vld [vmem:[%s4892_s1 + $0x188] sm:$0xff]  ;;  %v2338_v5 = vld [vmem:[%s4892_s1 + $0x190] sm:$0xff] }
   0x2   :  { %v2320_v2 = vld [vmem:[%s4892_s1 + $0x100] sm:$0xff]  ;;  %v3266_v3 = vpack.c.bf16 %v2337_v1, %v2336_v0  ;;  %v2321_v4 = vld [vmem:[%s4892_s1 + $0x108] sm:$0xff]  ;;  %v2339_v6 = vld [vmem:[%s4892_s1 + $0x198] sm:$0xff] }
   0x3   :  { %v3268_v7 = vpack.c.bf16 %v2321_v4, %v2320_v2  ;;  %v3270_v8 = vpack.c.bf16 %v2339_v6, %v2338_v5  ;;  %v2322_v9 = vld [vmem:[%s4892_s1 + $0x110] sm:$0xff]  ;;  %v2323_v10 = vld [vmem:[%s4892_s1 + $0x118] sm:$0xff]  ;;  %v2340_v11 = vld [vmem:[%s4892_s1 + $0x1a0] sm:$0xff] }
   0x4   :  { %3267 = vmatprep.subr.bf16.mxu1 %v3266_v3  ;;  %v2341_v12 = vld [vmem:[%s4892_s1 + $0x1a8] sm:$0xff]  ;;  %v3272_v13 = vpack.c.bf16 %v2323_v10, %v2322_v9  ;;  %v2324_v15 = vld [vmem:[%s4892_s1 + $0x120] sm:$0xff]  ;;  %v2342_v17 = vld [vmem:[%s4892_s1 + $0x1b0] sm:$0xff] }
   0x5   :  { %3269 = vmatpush3.bf16.msra.mxu1 %v3268_v7  ;;  %v3274_v14 = vpack.c.bf16 %v2341_v12, %v2340_v11  ;;  %v2325_v16 = vld [vmem:[%s4892_s1 + $0x128] sm:$0xff]  ;;  %v2343_v18 = vld [vmem:[%s4892_s1 + $0x1b8] sm:$0xff]  ;;  %v2326_v21 = vld [vmem:[%s4892_s1 + $0x130] sm:$0xff] }
   0x6   :  { %3271 = vmatprep.subr.bf16.mxu1 %v3270_v8  ;;  %v3276_v19 = vpack.c.bf16 %v2325_v16, %v2324_v15  ;;  %v3278_v20 = vpack.c.bf16 %v2343_v18, %v2342_v17  ;;  %v2327_v22 = vld [vmem:[%s4892_s1 + $0x138] sm:$0xff]  ;;  %v2344_v23 = vld [vmem:[%s4892_s1 + $0x1c0] sm:$0xff]  ;;  %v2345_v24 = vld [vmem:[%s4892_s1 + $0x1c8] sm:$0xff] }
   0x7   :  { %v3674_v25 = vld [vmem:[%s4893_s0 + $0x8] sm:$0xff]  ;;  %v3280_v26 = vpack.c.bf16 %v2327_v22, %v2326_v21  ;;  %v3282_v27 = vpack.c.bf16 %v2345_v24, %v2344_v23  ;;  %v2328_v28 = vld [vmem:[%s4892_s1 + $0x140] sm:$0xff]  ;;  %v2346_v30 = vld [vmem:[%s4892_s1 + $0x1d0] sm:$0xff] }
   0x8   :  { %226 = vmatprep.mubr.f32.mxu1 %v3674_v25  ;;  %115 = vmatprep.mubr.f32.mxu0 %v3674_v25  ;;  %v2329_v29 = vld [vmem:[%s4892_s1 + $0x148] sm:$0xff]  ;;  %v2347_v31 = vld [vmem:[%s4892_s1 + $0x1d8] sm:$0xff]  ;;  %v2330_v34 = vld [vmem:[%s4892_s1 + $0x150] sm:$0xff] }
   0x9   :  { %3273 = vmatpush3.bf16.msra.mxu1 %v3272_v13  ;;  %v3284_v32 = vpack.c.bf16 %v2329_v29, %v2328_v28  ;;  %v3286_v33 = vpack.c.bf16 %v2347_v31, %v2346_v30  ;;  %v2331_v35 = vld [vmem:[%s4892_s1 + $0x158] sm:$0xff]  ;;  %v2348_v36 = vld [vmem:[%s4892_s1 + $0x1e0] sm:$0xff]  ;;  %v2349_v37 = vld [vmem:[%s4892_s1 + $0x1e8] sm:$0xff] }
   0xa   :  { %3275 = vmatprep.subr.bf16.mxu1 %v3274_v14  ;;  %v3288_v38 = vpack.c.bf16 %v2331_v35, %v2330_v34  ;;  %v3290_v39 = vpack.c.bf16 %v2349_v37, %v2348_v36  ;;  %v2332_v40 = vld [vmem:[%s4892_s1 + $0x160] sm:$0xff]  ;;  %v2333_v41 = vld [vmem:[%s4892_s1 + $0x168] sm:$0xff]  ;;  %v2350_v42 = vld [vmem:[%s4892_s1 + $0x1f0] sm:$0xff] }
   0xb   :  { %v2351_v43 = vld [vmem:[%s4892_s1 + $0x1f8] sm:$0xff]  ;;  %v3292_v44 = vpack.c.bf16 %v2333_v41, %v2332_v40  ;;  %v2334_v46 = vld [vmem:[%s4892_s1 + $0x170] sm:$0xff]  ;;  %v3723_v49 = vld [vmem:[%s4893_s0] sm:$0xff] }
   0xc   :  { %v3294_v45 = vpack.c.bf16 %v2351_v43, %v2350_v42  ;;  %v2335_v47 = vld [vmem:[%s4892_s1 + $0x178] sm:$0xff]  ;;  %v35_v50 = vld [vmem:[%s4892_s1 + $0x80] sm:$0xff]  ;;  %v36_v51 = vld [vmem:[%s4892_s1 + $0x88] sm:$0xff] }
   0xd   :  { %3277 = vmatpush3.bf16.msra.mxu1 %v3276_v19  ;;  %v3296_v48 = vpack.c.bf16 %v2335_v47, %v2334_v46  ;;  %v3234_v52 = vpack.c.bf16 %v36_v51, %v35_v50  ;;  %v19_v53 = vld [vmem:[%s4892_s1] sm:$0xff]  ;;  %v20_v54 = vld [vmem:[%s4892_s1 + $0x8] sm:$0xff]  ;;  %v37_v57 = vld [vmem:[%s4892_s1 + $0x90] sm:$0xff] }
   0xe   :  { %3279 = vmatprep.subr.bf16.mxu1 %v3278_v20  ;;  %v3236_v55 = vpack.c.bf16 %v20_v54, %v19_v53  ;;  %v2352_v56 = vld [vmem:[%s4894_s2 + $0x40] sm:$0xff]  ;;  %v38_v58 = vld [vmem:[%s4892_s1 + $0x98] sm:$0xff]  ;;  %v21_v60 = vld [vmem:[%s4892_s1 + $0x10] sm:$0xff] }
   0xf   :  { %3235 = vmatprep.subr.bf16.mxu0 %v3234_v52  ;;  %v3238_v59 = vpack.c.bf16 %v38_v58, %v37_v57  ;;  %v22_v61 = vld [vmem:[%s4892_s1 + $0x18] sm:$0xff]  ;;  %v39_v63 = vld [vmem:[%s4892_s1 + $0xa0] sm:$0xff]  ;;  %v40_v0 = vld [vmem:[%s4892_s1 + $0xa8] sm:$0xff] }
  0x10   :  { %3237 = vmatpush3.bf16.msra.mxu0 %v3236_v55  ;;  %v3240_v62 = vpack.c.bf16 %v22_v61, %v21_v60  ;;  %v3242_v1 = vpack.c.bf16 %v40_v0, %v39_v63  ;;  %v23_v2 = vld [vmem:[%s4892_s1 + $0x20] sm:$0xff]  ;;  %v24_v3 = vld [vmem:[%s4892_s1 + $0x28] sm:$0xff]  ;;  %v41_v5 = vld [vmem:[%s4892_s1 + $0xb0] sm:$0xff] }
  0x11   :  { %3281 = vmatpush3.bf16.msra.mxu1 %v3280_v26  ;;  %3239 = vmatprep.subr.bf16.mxu0 %v3238_v59  ;;  %v3244_v4 = vpack.c.bf16 %v24_v3, %v23_v2  ;;  %v42_v6 = vld [vmem:[%s4892_s1 + $0xb8] sm:$0xff]  ;;  %v25_v8 = vld [vmem:[%s4892_s1 + $0x30] sm:$0xff]  ;;  %v43_v11 = vld [vmem:[%s4892_s1 + $0xc0] sm:$0xff] }
  0x12   :  { %3283 = vmatprep.subr.bf16.mxu1 %v3282_v27  ;;  %v3246_v7 = vpack.c.bf16 %v42_v6, %v41_v5  ;;  %v26_v9 = vld [vmem:[%s4892_s1 + $0x38] sm:$0xff]  ;;  %v44_v12 = vld [vmem:[%s4892_s1 + $0xc8] sm:$0xff]  ;;  %v27_v14 = vld [vmem:[%s4892_s1 + $0x40] sm:$0xff] }
  0x13   :  { %v3248_v10 = vpack.c.bf16 %v26_v9, %v25_v8  ;;  %v3250_v13 = vpack.c.bf16 %v44_v12, %v43_v11  ;;  %v28_v15 = vld [vmem:[%s4892_s1 + $0x48] sm:$0xff]  ;;  %v45_v17 = vld [vmem:[%s4892_s1 + $0xd0] sm:$0xff]  ;;  %v46_v18 = vld [vmem:[%s4892_s1 + $0xd8] sm:$0xff] }
  0x14   :  { %3241 = vmatpush3.bf16.msra.mxu0 %v3240_v62  ;;  %v3252_v16 = vpack.c.bf16 %v28_v15, %v27_v14  ;;  %v3254_v19 = vpack.c.bf16 %v46_v18, %v45_v17  ;;  %v29_v20 = vld [vmem:[%s4892_s1 + $0x50] sm:$0xff]  ;;  %v30_v21 = vld [vmem:[%s4892_s1 + $0x58] sm:$0xff]  ;;  %v47_v23 = vld [vmem:[%s4892_s1 + $0xe0] sm:$0xff] }
  0x15   :  { %3285 = vmatpush3.bf16.msra.mxu1 %v3284_v32  ;;  %3243 = vmatprep.subr.bf16.mxu0 %v3242_v1  ;;  %v3256_v22 = vpack.c.bf16 %v30_v21, %v29_v20  ;;  %v48_v24 = vld [vmem:[%s4892_s1 + $0xe8] sm:$0xff]  ;;  %v31_v27 = vld [vmem:[%s4892_s1 + $0x60] sm:$0xff]  ;;  %v49_v30 = vld [vmem:[%s4892_s1 + $0xf0] sm:$0xff] }
  0x16   :  { %3287 = vmatprep.subr.bf16.mxu1 %v3286_v33  ;;  %v3258_v26 = vpack.c.bf16 %v48_v24, %v47_v23  ;;  %v32_v28 = vld [vmem:[%s4892_s1 + $0x68] sm:$0xff]  ;;  %v50_v31 = vld [vmem:[%s4892_s1 + $0xf8] sm:$0xff]  ;;  %v33_v33 = vld [vmem:[%s4892_s1 + $0x70] sm:$0xff] }
  0x17   :  { %v3260_v29 = vpack.c.bf16 %v32_v28, %v31_v27  ;;  %v3262_v32 = vpack.c.bf16 %v50_v31, %v49_v30  ;;  %v34_v34 = vld [vmem:[%s4892_s1 + $0x78] sm:$0xff]  ;;  %v2392_v36 = vld [vmem:[%s4892_s1 + $0x280] sm:$0xff]  ;;  %v2393_v37 = vld [vmem:[%s4892_s1 + $0x288] sm:$0xff] }
  0x18   :  { %3245 = vmatpush3.bf16.msra.mxu0 %v3244_v4  ;;  %v3264_v35 = vpack.c.bf16 %v34_v34, %v33_v33  ;;  %v2377_v40 = vld [vmem:[%s4892_s1 + $0x208] sm:$0xff]  ;;  %v2394_v42 = vld [vmem:[%s4892_s1 + $0x290] sm:$0xff]  ;;  %v2395_v43 = vld [vmem:[%s4892_s1 + $0x298] sm:$0xff] }
  0x19   :  { %3289 = vmatpush3.bf16.msra.mxu1 %v3288_v38  ;;  %3247 = vmatprep.subr.bf16.mxu0 %v3246_v7  ;;  %v2353_v46 = vld [vmem:[%s4894_s2 + $0x48] sm:$0xff]  ;;  %v2378_v50 = vld [vmem:[%s4892_s1 + $0x210] sm:$0xff]  ;;  %v2379_v51 = vld [vmem:[%s4892_s1 + $0x218] sm:$0xff] }
  0x1a   :  { %3291 = vmatprep.subr.bf16.mxu1 %v3290_v39  ;;  %v2376_v39 = vld [vmem:[%s4892_s1 + $0x200] sm:$0xff]  ;;  %v2354_v52 = vld [vmem:[%s4894_s2 + $0x50] sm:$0xff]  ;;  %v2397_v54 = vld [vmem:[%s4892_s1 + $0x2a8] sm:$0xff]  ;;  %v3304_v55 = vpack.c.bf16 %v2379_v51, %v2378_v50 }
  0x1b   :  { %v3300_v47 = vpack.c.bf16 %v2377_v40, %v2376_v39  ;;  %v2396_v53 = vld [vmem:[%s4892_s1 + $0x2a0] sm:$0xff]  ;;  %v2381_v59 = vld [vmem:[%s4892_s1 + $0x228] sm:$0xff]  ;;  %v2398_v61 = vld [vmem:[%s4892_s1 + $0x2b0] sm:$0xff] }
  0x1c   :  { %3249 = vmatpush3.bf16.msra.mxu0 %v3248_v10  ;;  %v3306_v57 = vpack.c.bf16 %v2397_v54, %v2396_v53  ;;  %v2380_v58 = vld [vmem:[%s4892_s1 + $0x220] sm:$0xff]  ;;  %v2399_v62 = vld [vmem:[%s4892_s1 + $0x2b8] sm:$0xff]  ;;  %v2357_v0 = vld [vmem:[%s4894_s2 + $0x68] sm:$0xff] }
  0x1d   :  { %3293 = vmatpush3.bf16.msra.mxu1 %v3292_v44  ;;  %3251 = vmatprep.subr.bf16.mxu0 %v3250_v13  ;;  %v2356_v60 = vld [vmem:[%s4894_s2 + $0x60] sm:$0xff]  ;;  %v3308_v63 = vpack.c.bf16 %v2381_v59, %v2380_v58  ;;  %v3310_v1 = vpack.c.bf16 %v2399_v62, %v2398_v61  ;;  %v2382_v2 = vld [vmem:[%s4892_s1 + $0x230] sm:$0xff]  ;;  %v2383_v3 = vld [vmem:[%s4892_s1 + $0x238] sm:$0xff] }
  0x1e   :  { %3295 = vmatprep.subr.bf16.mxu1 %v3294_v45  ;;  %v3298_v45 = vpack.c.bf16 %v2393_v37, %v2392_v36  ;;  %v2358_v4 = vld [vmem:[%s4894_s2 + $0x70] sm:$0xff]  ;;  %v2400_v5 = vld [vmem:[%s4892_s1 + $0x2c0] sm:$0xff]  ;;  %v2401_v6 = vld [vmem:[%s4892_s1 + $0x2c8] sm:$0xff]  ;;  %v3312_v7 = vpack.c.bf16 %v2383_v3, %v2382_v2 }
  0x1f   :  { %v2359_v8 = vld [vmem:[%s4894_s2 + $0x78] sm:$0xff]  ;;  %v3314_v9 = vpack.c.bf16 %v2401_v6, %v2400_v5  ;;  %v2384_v10 = vld [vmem:[%s4892_s1 + $0x240] sm:$0xff]  ;;  %v2385_v11 = vld [vmem:[%s4892_s1 + $0x248] sm:$0xff] }
  0x20   :  { %3253 = vmatpush3.bf16.msra.mxu0 %v3252_v16  ;;  %v2402_v12 = vld [vmem:[%s4892_s1 + $0x2d0] sm:$0xff]  ;;  %v2403_v13 = vld [vmem:[%s4892_s1 + $0x2d8] sm:$0xff]  ;;  %v3316_v14 = vpack.c.bf16 %v2385_v11, %v2384_v10  ;;  %v2404_v18 = vld [vmem:[%s4892_s1 + $0x2e0] sm:$0xff] }
  0x21   :  { %3297 = vmatpush3.bf16.msra.mxu1 %v3296_v48  ;;  %3255 = vmatprep.subr.bf16.mxu0 %v3254_v19  ;;  %v3302_v48 = vpack.c.bf16 %v2395_v43, %v2394_v42  ;;  %v3318_v15 = vpack.c.bf16 %v2403_v13, %v2402_v12  ;;  %v2386_v16 = vld [vmem:[%s4892_s1 + $0x250] sm:$0xff]  ;;  %v2387_v17 = vld [vmem:[%s4892_s1 + $0x258] sm:$0xff]  ;;  %v2405_v19 = vld [vmem:[%s4892_s1 + $0x2e8] sm:$0xff] }
  0x22   :  { %v3320_v20 = vpack.c.bf16 %v2387_v17, %v2386_v16  ;;  %v3322_v21 = vpack.c.bf16 %v2405_v19, %v2404_v18  ;;  %v2389_v23 = vld [vmem:[%s4892_s1 + $0x268] sm:$0xff]  ;;  %v2406_v24 = vld [vmem:[%s4892_s1 + $0x2f0] sm:$0xff]  ;;  %v2391_v30 = vld [vmem:[%s4892_s1 + $0x278] sm:$0xff] }
  0x23   :  { %v2440_v31 = vld [vmem:[%s4892_s1 + $0x380] sm:$0xff]  ;;  %v2425_v36 = vld [vmem:[%s4892_s1 + $0x308] sm:$0xff]  ;;  %v2442_v37 = vld [vmem:[%s4892_s1 + $0x390] sm:$0xff] }
  0x24   :  { %227 = vmatmul.mubr.f32.vlgmr.msra.gmra.mrb[0].mxu1 %v3723_v49  ;;  %3257 = vmatpush3.bf16.msra.mxu0 %v3256_v22  ;;  %v2388_v22 = vld [vmem:[%s4892_s1 + $0x260] sm:$0xff]  ;;  %v2427_v42 = vld [vmem:[%s4892_s1 + $0x318] sm:$0xff]  ;;  %v2446_v50 = vld [vmem:[%s4892_s1 + $0x3b0] sm:$0xff] }
  0x25   :  { %3110 = vmatprep.mubr.msk.f32.mxu1 %vm241_vm0, %v2352_v56  ;;  %3259 = vmatprep.subr.bf16.mxu0 %v3258_v26  ;;  %v2355_v56 = vld [vmem:[%s4894_s2 + $0x58] sm:$0xff]  ;;  %v3324_v27 = vpack.c.bf16 %v2389_v23, %v2388_v22  ;;  %v2444_v43 = vld [vmem:[%s4892_s1 + $0x3a0] sm:$0xff]  ;;  %v2430_v54 = vld [vmem:[%s4892_s1 + $0x330] sm:$0xff] }
  0x26   :  { %v2407_v26 = vld [vmem:[%s4892_s1 + $0x2f8] sm:$0xff]  ;;  %v2433_v61 = vld [vmem:[%s4892_s1 + $0x348] sm:$0xff]  ;;  %v2450_v62 = vld [vmem:[%s4892_s1 + $0x3d0] sm:$0xff] }
  0x27   :  { %v3326_v28 = vpack.c.bf16 %v2407_v26, %v2406_v24  ;;  %v2447_v51 = vld [vmem:[%s4892_s1 + $0x3b8] sm:$0xff]  ;;  %v2434_v2 = vld [vmem:[%s4892_s1 + $0x350] sm:$0xff]  ;;  %v2453_v5 = vld [vmem:[%s4892_s1 + $0x3e8] sm:$0xff] }
  0x28   :  { %3261 = vmatpush3.bf16.msra.mxu0 %v3260_v29  ;;  %v2390_v29 = vld [vmem:[%s4892_s1 + $0x270] sm:$0xff]  ;;  %v3342_v53 = vpack.c.bf16 %v2447_v51, %v2446_v50  ;;  %v2435_v3 = vld [vmem:[%s4892_s1 + $0x358] sm:$0xff]  ;;  %v125_v24 = vld [vmem:[%s4894_s2 + $0x20] sm:$0xff] }
  0x29   :  { %3263 = vmatprep.subr.bf16.mxu0 %v3262_v32  ;;  %v2441_v32 = vld [vmem:[%s4892_s1 + $0x388] sm:$0xff]  ;;  %v3328_v33 = vpack.c.bf16 %v2391_v30, %v2390_v29  ;;  %v3352_v6 = vpack.c.bf16 %v2435_v3, %v2434_v2  ;;  %v2454_v10 = vld [vmem:[%s4892_s1 + $0x3f0] sm:$0xff]  ;;  %v2455_v11 = vld [vmem:[%s4892_s1 + $0x3f8] sm:$0xff] }
  0x2a   :  { %v3330_v34 = vpack.c.bf16 %v2441_v32, %v2440_v31  ;;  %v3358_v13 = vpack.c.bf16 %v2455_v11, %v2454_v10  ;;  %v123_v22 = vld [vmem:[%s4894_s2 + $0x10] sm:$0xff]  ;;  %v124_v23 = vld [vmem:[%s4894_s2 + $0x18] sm:$0xff]  ;;  %v126_v26 = vld [vmem:[%s4894_s2 + $0x28] sm:$0xff] }
  0x2b   :  { %v2408_v29 = vld [vmem:[%s4894_s2 + $0x80] sm:$0xff]  ;;  %v2537_v31 = vld [vmem:[%s4892_s1 + $0x588] sm:$0xff]  ;;  %v2543_v50 = vld [vmem:[%s4892_s1 + $0x5b8] sm:$0xff] }
  0x2c   :  { %3265 = vmatpush3.bf16.msra.mxu0 %v3264_v35  ;;  %v2424_v35 = vld [vmem:[%s4892_s1 + $0x300] sm:$0xff]  ;;  %v2526_v51 = vld [vmem:[%s4892_s1 + $0x530] sm:$0xff]  ;;  %v2551_v10 = vld [vmem:[%s4892_s1 + $0x5f8] sm:$0xff] }
  0x2d   :  { %v3332_v39 = vpack.c.bf16 %v2425_v36, %v2424_v35  ;;  %v2536_v30 = vld [vmem:[%s4892_s1 + $0x580] sm:$0xff]  ;;  %v2538_v36 = vld [vmem:[%s4892_s1 + $0x590] sm:$0xff] }
  0x2e   :  { %v3394_v32 = vpack.c.bf16 %v2537_v31, %v2536_v30  ;;  %v2548_v3 = vld [vmem:[%s4892_s1 + $0x5e0] sm:$0xff]  ;;  %v2534_v11 = vld [vmem:[%s4892_s1 + $0x570] sm:$0xff] }
  0x2f   :  { %116 = vmatmul.mubr.f32.vlgmr.msra.gmra.mrb[0].mxu0 %v3723_v49  ;;  %v2572_v30 = vld [vmem:[%s4892_s1 + $0x620] sm:$0xff] }
  0xf7   :  { %v2779_v38 = vpop.f32.mrb[0].mxu1 }
  0xf8   :  { %v2780_v41 = vpop.f32.mrb[1].mxu1 }
  0xf9   :  { %v2781_v44 = vadd.f32 %v2780_v41, %v2779_v38  ;;  %v2443_v38 = vld [vmem:[%s4892_s1 + $0x398] sm:$0xff]  ;;  %v2426_v41 = vld [vmem:[%s4892_s1 + $0x310] sm:$0xff] }
  0xfa   :  { %v3334_v40 = vpack.c.bf16 %v2443_v38, %v2442_v37  ;;  %v2539_v37 = vld [vmem:[%s4892_s1 + $0x598] sm:$0xff]  ;;  %v2522_v38 = vld [vmem:[%s4892_s1 + $0x510] sm:$0xff] }
  0xfb   :  { %3108 = vmatprep.subr.mxu1 %v2781_v44 }
  0xfc   :  { %3109 = vmatpush3.msra.mxu1 %v2781_v44  ;;  %v2445_v44 = vld [vmem:[%s4892_s1 + $0x3a8] sm:$0xff] }
  0xfd   :  { %3111 = vmatmul.mubr.msk.f32.vlgmr.msra.gmra.mrb[2].mxu1 %vm241_vm0, %v2353_v46  ;;  %3299 = vmatprep.subr.bf16.mxu1 %v3298_v45  ;;  %v3336_v45 = vpack.c.bf16 %v2427_v42, %v2426_v41  ;;  %v3338_v46 = vpack.c.bf16 %v2445_v44, %v2444_v43  ;;  %v2540_v42 = vld [vmem:[%s4892_s1 + $0x5a0] sm:$0xff]  ;;  %v2541_v43 = vld [vmem:[%s4892_s1 + $0x5a8] sm:$0xff] }
  0xfe   :  { %3301 = vmatpush3.bf16.msra.mxu1 %v3300_v47  ;;  %3113 = vmatprep.mubr.msk.f32.mxu1 %vm241_vm0, %v2354_v52  ;;  %v2428_v47 = vld [vmem:[%s4892_s1 + $0x320] sm:$0xff] }
  0xff   :  { %3303 = vmatprep.subr.bf16.mxu1 %v3302_v48  ;;  %v2429_v48 = vld [vmem:[%s4892_s1 + $0x328] sm:$0xff]  ;;  %v2524_v44 = vld [vmem:[%s4892_s1 + $0x520] sm:$0xff] }
 0x100   :  { %v3340_v52 = vpack.c.bf16 %v2429_v48, %v2428_v47  ;;  %v2542_v48 = vld [vmem:[%s4892_s1 + $0x5b0] sm:$0xff] }
 0x101   :  { %3114 = vmatmul.mubr.msk.f32.gmra.mrb[4].mxu1 %vm241_vm0, %v2355_v56  ;;  %v2448_v56 = vld [vmem:[%s4892_s1 + $0x3c0] sm:$0xff] }
 0x102   :  { %3305 = vmatpush3.bf16.msra.mxu1 %v3304_v55  ;;  %3116 = vmatprep.mubr.msk.f32.mxu1 %vm241_vm0, %v2356_v60  ;;  %v2431_v55 = vld [vmem:[%s4892_s1 + $0x338] sm:$0xff]  ;;  %v2432_v60 = vld [vmem:[%s4892_s1 + $0x340] sm:$0xff]  ;;  %v2744_v17 = vpop.f32.mrb[0].mxu0 }
 0x103   :  { %3307 = vmatprep.subr.bf16.mxu1 %v3306_v57  ;;  %v2449_v57 = vld [vmem:[%s4892_s1 + $0x3c8] sm:$0xff]  ;;  %v3344_v58 = vpack.c.bf16 %v2431_v55, %v2430_v54  ;;  %v2745_v18 = vpop.f32.mrb[1].mxu0  ;;  %v2544_v55 = vld [vmem:[%s4892_s1 + $0x5c0] sm:$0xff] }
 0x104   :  { %v3346_v59 = vpack.c.bf16 %v2449_v57, %v2448_v56  ;;  %v2746_v19 = vadd.f32 %v2745_v18, %v2744_v17  ;;  %v2545_v56 = vld [vmem:[%s4892_s1 + $0x5c8] sm:$0xff]  ;;  %v2528_v57 = vld [vmem:[%s4892_s1 + $0x540] sm:$0xff] }
 0x105   :  { %3117 = vmatmul.mubr.msk.f32.gmra.mrb[6].mxu1 %vm241_vm0, %v2357_v0  ;;  %v3348_v0 = vpack.c.bf16 %v2433_v61, %v2432_v60  ;;  %v2546_v61 = vld [vmem:[%s4892_s1 + $0x5d0] sm:$0xff]  ;;  %v2568_v17 = vld [vmem:[%s4892_s1 + $0x600] sm:$0xff] }
 0x106   :  { %3309 = vmatpush3.bf16.msra.mxu1 %v3308_v63  ;;  %3119 = vmatprep.mubr.msk.f32.mxu1 %vm241_vm0, %v2358_v4  ;;  %v2451_v63 = vld [vmem:[%s4892_s1 + $0x3d8] sm:$0xff]  ;;  %v2452_v4 = vld [vmem:[%s4892_s1 + $0x3e0] sm:$0xff] }
 0x107   :  { %3311 = vmatprep.subr.bf16.mxu1 %v3310_v1  ;;  %v3350_v1 = vpack.c.bf16 %v2451_v63, %v2450_v62  ;;  %3122 = vmatprep.subr.mxu0 %v2746_v19  ;;  %v2547_v62 = vld [vmem:[%s4892_s1 + $0x5d8] sm:$0xff]  ;;  %v2530_v63 = vld [vmem:[%s4892_s1 + $0x550] sm:$0xff] }
 0x108   :  { %3123 = vmatpush3.msra.mxu0 %v2746_v19  ;;  %v2569_v19 = vld [vmem:[%s4892_s1 + $0x608] sm:$0xff] }
 0x109   :  { %3120 = vmatmul.mubr.msk.f32.gmra.mrb[8].mxu1 %vm241_vm0, %v2359_v8  ;;  %v2436_v8 = vld [vmem:[%s4892_s1 + $0x360] sm:$0xff] }
 0x10a   :  { %3313 = vmatpush3.bf16.msra.mxu1 %v3312_v7  ;;  %597 = vmatprep.mubr.f32.mxu1 %v3674_v25  ;;  %v3354_v7 = vpack.c.bf16 %v2453_v5, %v2452_v4  ;;  %v2549_v4 = vld [vmem:[%s4892_s1 + $0x5e8] sm:$0xff]  ;;  %v2532_v5 = vld [vmem:[%s4892_s1 + $0x560] sm:$0xff] }
 0x10b   :  { %3315 = vmatprep.subr.bf16.mxu1 %v3314_v9  ;;  %v2437_v9 = vld [vmem:[%s4892_s1 + $0x368] sm:$0xff] }
 0x10c   :  { %v3356_v12 = vpack.c.bf16 %v2437_v9, %v2436_v8  ;;  %v2550_v9 = vld [vmem:[%s4892_s1 + $0x5f0] sm:$0xff] }
 0x10e   :  { %3317 = vmatpush3.bf16.msra.mxu1 %v3316_v14  ;;  %v2438_v14 = vld [vmem:[%s4892_s1 + $0x370] sm:$0xff] }
 0x10f   :  { %3319 = vmatprep.subr.bf16.mxu1 %v3318_v15  ;;  %v2439_v15 = vld [vmem:[%s4892_s1 + $0x378] sm:$0xff] }
 0x110   :  { %v3360_v16 = vpack.c.bf16 %v2439_v15, %v2438_v14  ;;  %v2584_v15 = vld [vmem:[%s4892_s1 + $0x680] sm:$0xff] }
 0x112   :  { %3321 = vmatpush3.bf16.msra.mxu1 %v3320_v20  ;;  %v121_v20 = vld [vmem:[%s4894_s2] sm:$0xff] }
 0x113   :  { %3323 = vmatprep.subr.bf16.mxu1 %v3322_v21  ;;  %3124 = vmatprep.mubr.msk.f32.mxu0 %vm241_vm0, %v121_v20  ;;  %v122_v21 = vld [vmem:[%s4894_s2 + $0x8] sm:$0xff]  ;;  %v3428_v20 = vpack.c.bf16 %v2569_v19, %v2568_v17  ;;  %v2414_v17 = vld [vmem:[%s4894_s2 + $0xb0] sm:$0xff]  ;;  %v2456_v19 = vld [vmem:[%s4894_s2 + $0xc0] sm:$0xff] }
 0x114   :  { %3125 = vmatmul.mubr.msk.f32.vlgmr.msra.gmra.mrb[2].mxu0 %vm241_vm0, %v122_v21  ;;  %v2586_v21 = vld [vmem:[%s4892_s1 + $0x690] sm:$0xff] }
 0x115   :  { %3127 = vmatprep.mubr.msk.f32.mxu0 %vm241_vm0, %v123_v22  ;;  %v2587_v22 = vld [vmem:[%s4892_s1 + $0x698] sm:$0xff] }
 0x116   :  { %3325 = vmatpush3.bf16.msra.mxu1 %v3324_v27  ;;  %v127_v27 = vld [vmem:[%s4894_s2 + $0x30] sm:$0xff] }
 0x117   :  { %3327 = vmatprep.subr.bf16.mxu1 %v3326_v28  ;;  %v128_v28 = vld [vmem:[%s4894_s2 + $0x38] sm:$0xff] }
 0x118   :  { %3128 = vmatmul.mubr.msk.f32.gmra.mrb[4].mxu0 %vm241_vm0, %v124_v23  ;;  %v3430_v23 = vpack.c.bf16 %v2587_v22, %v2586_v21  ;;  %v2489_v21 = vld [vmem:[%s4892_s1 + $0x488] sm:$0xff] }
 0x119   :  { %3130 = vmatprep.mubr.msk.f32.mxu0 %vm241_vm0, %v125_v24  ;;  %v2570_v24 = vld [vmem:[%s4892_s1 + $0x610] sm:$0xff] }
 0x11a   :  { %3329 = vmatpush3.bf16.msra.mxu1 %v3328_v33  ;;  %v2520_v33 = vld [vmem:[%s4892_s1 + $0x500] sm:$0xff] }
 0x11b   :  { %3331 = vmatprep.subr.bf16.mxu1 %v3330_v34  ;;  %v2521_v34 = vld [vmem:[%s4892_s1 + $0x508] sm:$0xff] }
 0x11c   :  { %3131 = vmatmul.mubr.msk.f32.gmra.mrb[6].mxu0 %vm241_vm0, %v126_v26  ;;  %v3396_v35 = vpack.c.bf16 %v2521_v34, %v2520_v33  ;;  %v2571_v26 = vld [vmem:[%s4892_s1 + $0x618] sm:$0xff]  ;;  %v2590_v33 = vld [vmem:[%s4892_s1 + $0x6b0] sm:$0xff] }
 0x11d   :  { %598 = vmatmul.mubr.f32.vlgmr.msra.gmra.mrb[10].mxu1 %v3723_v49  ;;  %3133 = vmatprep.mubr.msk.f32.mxu0 %vm241_vm0, %v127_v27  ;;  %v3432_v27 = vpack.c.bf16 %v2571_v26, %v2570_v24  ;;  %v2591_v34 = vld [vmem:[%s4892_s1 + $0x6b8] sm:$0xff]  ;;  %v2473_v24 = vld [vmem:[%s4892_s1 + $0x408] sm:$0xff] }
 0x11e   :  { %3333 = vmatpush3.bf16.msra.mxu1 %v3332_v39  ;;  %846 = vmatprep.mubr.f32.mxu1 %v3674_v25  ;;  %v3398_v39 = vpack.c.bf16 %v2539_v37, %v2538_v36  ;;  %v3438_v36 = vpack.c.bf16 %v2591_v34, %v2590_v33  ;;  %v2574_v37 = vld [vmem:[%s4892_s1 + $0x630] sm:$0xff] }
 0x11f   :  { %3335 = vmatprep.subr.bf16.mxu1 %v3334_v40  ;;  %v2523_v40 = vld [vmem:[%s4892_s1 + $0x518] sm:$0xff]  ;;  %v2474_v34 = vld [vmem:[%s4892_s1 + $0x410] sm:$0xff] }
 0x120   :  { %3134 = vmatmul.mubr.msk.f32.gmra.mrb[8].mxu0 %vm241_vm0, %v128_v28  ;;  %v3400_v41 = vpack.c.bf16 %v2523_v40, %v2522_v38  ;;  %v2588_v28 = vld [vmem:[%s4892_s1 + $0x6a0] sm:$0xff]  ;;  %v2575_v38 = vld [vmem:[%s4892_s1 + $0x638] sm:$0xff]  ;;  %v2593_v40 = vld [vmem:[%s4892_s1 + $0x6c8] sm:$0xff] }
 0x121   :  { %3138 = vmatprep.mubr.msk.f32.mxu0 %vm241_vm0, %v2408_v29  ;;  %v2589_v29 = vld [vmem:[%s4892_s1 + $0x6a8] sm:$0xff] }
 0x122   :  { %3337 = vmatpush3.bf16.msra.mxu1 %v3336_v45  ;;  %v2525_v45 = vld [vmem:[%s4892_s1 + $0x528] sm:$0xff]  ;;  %v3434_v31 = vpack.c.bf16 %v2589_v29, %v2588_v28  ;;  %v2491_v28 = vld [vmem:[%s4892_s1 + $0x498] sm:$0xff] }
 0x123   :  { %3339 = vmatprep.subr.bf16.mxu1 %v3338_v46  ;;  %v3402_v46 = vpack.c.bf16 %v2541_v43, %v2540_v42  ;;  %v3404_v47 = vpack.c.bf16 %v2525_v45, %v2524_v44  ;;  %v2576_v43 = vld [vmem:[%s4892_s1 + $0x640] sm:$0xff]  ;;  %v2577_v44 = vld [vmem:[%s4892_s1 + $0x648] sm:$0xff]  ;;  %v2594_v45 = vld [vmem:[%s4892_s1 + $0x6d0] sm:$0xff] }
 0x126   :  { %3341 = vmatpush3.bf16.msra.mxu1 %v3340_v52  ;;  %v2527_v52 = vld [vmem:[%s4892_s1 + $0x538] sm:$0xff] }
 0x127   :  { %3343 = vmatprep.subr.bf16.mxu1 %v3342_v53  ;;  %v3406_v53 = vpack.c.bf16 %v2543_v50, %v2542_v48  ;;  %v3408_v54 = vpack.c.bf16 %v2527_v52, %v2526_v51  ;;  %v2578_v50 = vld [vmem:[%s4892_s1 + $0x650] sm:$0xff]  ;;  %v2579_v51 = vld [vmem:[%s4892_s1 + $0x658] sm:$0xff]  ;;  %v2596_v52 = vld [vmem:[%s4892_s1 + $0x6e0] sm:$0xff] }
 0x12a   :  { %3345 = vmatpush3.bf16.msra.mxu1 %v3344_v58  ;;  %v2529_v58 = vld [vmem:[%s4892_s1 + $0x548] sm:$0xff] }
 0x12b   :  { %3347 = vmatprep.subr.bf16.mxu1 %v3346_v59  ;;  %v3410_v59 = vpack.c.bf16 %v2545_v56, %v2544_v55  ;;  %v3412_v60 = vpack.c.bf16 %v2529_v58, %v2528_v57  ;;  %v2580_v56 = vld [vmem:[%s4892_s1 + $0x660] sm:$0xff]  ;;  %v2581_v57 = vld [vmem:[%s4892_s1 + $0x668] sm:$0xff]  ;;  %v2598_v58 = vld [vmem:[%s4892_s1 + $0x6f0] sm:$0xff] }
 0x12e   :  { %3349 = vmatpush3.bf16.msra.mxu1 %v3348_v0  ;;  %v2531_v0 = vld [vmem:[%s4892_s1 + $0x558] sm:$0xff] }
 0x12f   :  { %3351 = vmatprep.subr.bf16.mxu1 %v3350_v1  ;;  %v3414_v1 = vpack.c.bf16 %v2547_v62, %v2546_v61  ;;  %v3416_v2 = vpack.c.bf16 %v2531_v0, %v2530_v63  ;;  %v2582_v62 = vld [vmem:[%s4892_s1 + $0x670] sm:$0xff]  ;;  %v2583_v63 = vld [vmem:[%s4892_s1 + $0x678] sm:$0xff] }
 0x130   :  { %v3456_v0 = vpack.c.bf16 %v2583_v63, %v2582_v62  ;;  %v2499_v62 = vld [vmem:[%s4892_s1 + $0x4d8] sm:$0xff] }
 0x132   :  { %3353 = vmatpush3.bf16.msra.mxu1 %v3352_v6  ;;  %v3418_v6 = vpack.c.bf16 %v2549_v4, %v2548_v3 }
 0x133   :  { %3355 = vmatprep.subr.bf16.mxu1 %v3354_v7  ;;  %v2533_v7 = vld [vmem:[%s4892_s1 + $0x568] sm:$0xff] }
 0x134   :  { %v3420_v8 = vpack.c.bf16 %v2533_v7, %v2532_v5 }
 0x136   :  { %3357 = vmatpush3.bf16.msra.mxu1 %v3356_v12  ;;  %v3422_v12 = vpack.c.bf16 %v2551_v10, %v2550_v9 }
 0x137   :  { %3359 = vmatprep.subr.bf16.mxu1 %v3358_v13  ;;  %v2535_v13 = vld [vmem:[%s4892_s1 + $0x578] sm:$0xff] }
 0x138   :  { %v3424_v14 = vpack.c.bf16 %v2535_v13, %v2534_v11  ;;  %v2410_v13 = vld [vmem:[%s4894_s2 + $0x90] sm:$0xff] }
 0x13a   :  { %3361 = vmatpush3.bf16.msra.mxu1 %v3360_v16  ;;  %v2585_v16 = vld [vmem:[%s4892_s1 + $0x688] sm:$0xff] }
 0x13b   :  { %3395 = vmatprep.subr.bf16.mxu1 %v3394_v32  ;;  %v3426_v18 = vpack.c.bf16 %v2585_v16, %v2584_v15  ;;  %v2573_v32 = vld [vmem:[%s4892_s1 + $0x628] sm:$0xff]  ;;  %v2412_v15 = vld [vmem:[%s4894_s2 + $0xa0] sm:$0xff] }
 0x13c   :  { %v2413_v16 = vld [vmem:[%s4894_s2 + $0xa8] sm:$0xff] }
 0x13d   :  { %847 = vmatmul.mubr.f32.vlgmr.msra.gmra.mrb[12].mxu1 %v3723_v49 }
 0x13e   :  { %1344 = vmatprep.mubr.f32.mxu1 %v3674_v25  ;;  %3397 = vmatpush3.bf16.msra.mxu1 %v3396_v35  ;;  %v3436_v35 = vpack.c.bf16 %v2573_v32, %v2572_v30 }
 0x13f   :  { %3399 = vmatprep.subr.bf16.mxu1 %v3398_v39  ;;  %v2592_v39 = vld [vmem:[%s4892_s1 + $0x6c0] sm:$0xff] }
 0x140   :  { %v3442_v42 = vpack.c.bf16 %v2593_v40, %v2592_v39  ;;  %v2459_v40 = vld [vmem:[%s4894_s2 + $0xd8] sm:$0xff] }
 0x142   :  { %3401 = vmatpush3.bf16.msra.mxu1 %v3400_v41  ;;  %v3440_v41 = vpack.c.bf16 %v2575_v38, %v2574_v37  ;;  %v2492_v37 = vld [vmem:[%s4892_s1 + $0x4a0] sm:$0xff]  ;;  %v2493_v38 = vld [vmem:[%s4892_s1 + $0x4a8] sm:$0xff] }
 0x143   :  { %3403 = vmatprep.subr.bf16.mxu1 %v3402_v46  ;;  %v2595_v46 = vld [vmem:[%s4892_s1 + $0x6d8] sm:$0xff] }
 0x144   :  { %v3446_v48 = vpack.c.bf16 %v2595_v46, %v2594_v45  ;;  %v2494_v45 = vld [vmem:[%s4892_s1 + $0x4b0] sm:$0xff]  ;;  %v2495_v46 = vld [vmem:[%s4892_s1 + $0x4b8] sm:$0xff] }
 0x146   :  { %3405 = vmatpush3.bf16.msra.mxu1 %v3404_v47  ;;  %v3444_v47 = vpack.c.bf16 %v2577_v44, %v2576_v43  ;;  %v2477_v43 = vld [vmem:[%s4892_s1 + $0x428] sm:$0xff]  ;;  %v2460_v44 = vld [vmem:[%s4894_s2 + $0xe0] sm:$0xff] }
 0x147   :  { %3407 = vmatprep.subr.bf16.mxu1 %v3406_v53  ;;  %v2597_v53 = vld [vmem:[%s4892_s1 + $0x6e8] sm:$0xff] }
 0x148   :  { %v3450_v55 = vpack.c.bf16 %v2597_v53, %v2596_v52  ;;  %v2479_v52 = vld [vmem:[%s4892_s1 + $0x438] sm:$0xff]  ;;  %v2462_v53 = vld [vmem:[%s4894_s2 + $0xf0] sm:$0xff] }
 0x14a   :  { %3409 = vmatpush3.bf16.msra.mxu1 %v3408_v54  ;;  %v3448_v54 = vpack.c.bf16 %v2579_v51, %v2578_v50  ;;  %v3374_v50 = vpack.c.bf16 %v2495_v46, %v2494_v45  ;;  %v2478_v51 = vld [vmem:[%s4892_s1 + $0x430] sm:$0xff]  ;;  %v2668_v45 = vld [vmem:[%s4892_s1 + $0x820] sm:$0xff]  ;;  %v2669_v46 = vld [vmem:[%s4892_s1 + $0x828] sm:$0xff] }
 0x14b   :  { %3411 = vmatprep.subr.bf16.mxu1 %v3410_v59  ;;  %v2599_v59 = vld [vmem:[%s4892_s1 + $0x6f8] sm:$0xff] }
 0x14c   :  { %v3454_v61 = vpack.c.bf16 %v2599_v59, %v2598_v58  ;;  %v2480_v59 = vld [vmem:[%s4892_s1 + $0x440] sm:$0xff] }
 0x14e   :  { %3413 = vmatpush3.bf16.msra.mxu1 %v3412_v60  ;;  %v3452_v60 = vpack.c.bf16 %v2581_v57, %v2580_v56  ;;  %v3376_v56 = vpack.c.bf16 %v2479_v52, %v2478_v51  ;;  %v2463_v57 = vld [vmem:[%s4894_s2 + $0xf8] sm:$0xff]  ;;  %v2670_v52 = vld [vmem:[%s4892_s1 + $0x830] sm:$0xff] }
 0x14f   :  { %3415 = vmatprep.subr.bf16.mxu1 %v3414_v1 }
 0x152   :  { %3417 = vmatpush3.bf16.msra.mxu1 %v3416_v2 }
 0x153   :  { %3419 = vmatprep.subr.bf16.mxu1 %v3418_v6 }
 0x156   :  { %3421 = vmatpush3.bf16.msra.mxu1 %v3420_v8 }
 0x157   :  { %3423 = vmatprep.subr.bf16.mxu1 %v3422_v12  ;;  %v2409_v12 = vld [vmem:[%s4894_s2 + $0x88] sm:$0xff] }
 0x15a   :  { %3425 = vmatpush3.bf16.msra.mxu1 %v3424_v14  ;;  %v2411_v14 = vld [vmem:[%s4894_s2 + $0x98] sm:$0xff] }
 0x15b   :  { %3427 = vmatprep.subr.bf16.mxu1 %v3426_v18  ;;  %v2415_v18 = vld [vmem:[%s4894_s2 + $0xb8] sm:$0xff] }
 0x15d   :  { %1345 = vmatmul.mubr.f32.vlgmr.msra.gmra.mrb[14].mxu1 %v3723_v49 }
 0x15e   :  { %3429 = vmatpush3.bf16.msra.mxu1 %v3428_v20  ;;  %1593 = vmatprep.mubr.f32.mxu1 %v3674_v25  ;;  %v2488_v20 = vld [vmem:[%s4892_s1 + $0x480] sm:$0xff] }
 0x15f   :  { %3431 = vmatprep.subr.bf16.mxu1 %v3430_v23  ;;  %v2472_v23 = vld [vmem:[%s4892_s1 + $0x400] sm:$0xff]  ;;  %v3362_v30 = vpack.c.bf16 %v2489_v21, %v2488_v20  ;;  %v2486_v20 = vld [vmem:[%s4892_s1 + $0x470] sm:$0xff]  ;;  %v2487_v21 = vld [vmem:[%s4892_s1 + $0x478] sm:$0xff] }
 0x160   :  { %v3364_v32 = vpack.c.bf16 %v2473_v24, %v2472_v23 }
 0x162   :  { %3433 = vmatpush3.bf16.msra.mxu1 %v3432_v27  ;;  %v2490_v27 = vld [vmem:[%s4892_s1 + $0x490] sm:$0xff] }
 0x163   :  { %3435 = vmatprep.subr.bf16.mxu1 %v3434_v31  ;;  %v2457_v31 = vld [vmem:[%s4894_s2 + $0xc8] sm:$0xff]  ;;  %v3366_v33 = vpack.c.bf16 %v2491_v28, %v2490_v27  ;;  %v2504_v27 = vld [vmem:[%s4894_s2 + $0x100] sm:$0xff] }
 0x166   :  { %3437 = vmatpush3.bf16.msra.mxu1 %v3436_v35  ;;  %v2475_v35 = vld [vmem:[%s4892_s1 + $0x418] sm:$0xff] }
 0x167   :  { %3439 = vmatprep.subr.bf16.mxu1 %v3438_v36  ;;  %v2458_v36 = vld [vmem:[%s4894_s2 + $0xd0] sm:$0xff]  ;;  %v3368_v39 = vpack.c.bf16 %v2475_v35, %v2474_v34  ;;  %v2665_v34 = vld [vmem:[%s4892_s1 + $0x808] sm:$0xff] }
 0x16a   :  { %3441 = vmatpush3.bf16.msra.mxu1 %v3440_v41  ;;  %v3370_v41 = vpack.c.bf16 %v2493_v38, %v2492_v37  ;;  %v2683_v37 = vld [vmem:[%s4892_s1 + $0x898] sm:$0xff] }
 0x16b   :  { %3443 = vmatprep.subr.bf16.mxu1 %v3442_v42  ;;  %v2476_v42 = vld [vmem:[%s4892_s1 + $0x420] sm:$0xff] }
 0x16e   :  { %3445 = vmatpush3.bf16.msra.mxu1 %v3444_v47  ;;  %v3372_v47 = vpack.c.bf16 %v2477_v43, %v2476_v42  ;;  %v2684_v42 = vld [vmem:[%s4892_s1 + $0x8a0] sm:$0xff]  ;;  %v2685_v43 = vld [vmem:[%s4892_s1 + $0x8a8] sm:$0xff] }
 0x16f   :  { %3447 = vmatprep.subr.bf16.mxu1 %v3446_v48  ;;  %v2461_v48 = vld [vmem:[%s4894_s2 + $0xe8] sm:$0xff] }
 0x172   :  { %3449 = vmatpush3.bf16.msra.mxu1 %v3448_v54  ;;  %v2496_v54 = vld [vmem:[%s4892_s1 + $0x4c0] sm:$0xff] }
 0x173   :  { %3451 = vmatprep.subr.bf16.mxu1 %v3450_v55  ;;  %v2497_v55 = vld [vmem:[%s4892_s1 + $0x4c8] sm:$0xff] }
 0x174   :  { %v3378_v58 = vpack.c.bf16 %v2497_v55, %v2496_v54  ;;  %v2688_v55 = vld [vmem:[%s4892_s1 + $0x8c0] sm:$0xff] }
 0x176   :  { %3453 = vmatpush3.bf16.msra.mxu1 %v3452_v60  ;;  %v2481_v60 = vld [vmem:[%s4892_s1 + $0x448] sm:$0xff] }
 0x177   :  { %3455 = vmatprep.subr.bf16.mxu1 %v3454_v61  ;;  %v2498_v61 = vld [vmem:[%s4892_s1 + $0x4d0] sm:$0xff]  ;;  %v3380_v63 = vpack.c.bf16 %v2481_v60, %v2480_v59  ;;  %v2673_v59 = vld [vmem:[%s4892_s1 + $0x848] sm:$0xff] }
 0x17a   :  { %3457 = vmatpush3.bf16.msra.mxu1 %v3456_v0  ;;  %v3382_v0 = vpack.c.bf16 %v2499_v62, %v2498_v61  ;;  %v2690_v61 = vld [vmem:[%s4892_s1 + $0x8d0] sm:$0xff]  ;;  %v2691_v62 = vld [vmem:[%s4892_s1 + $0x8d8] sm:$0xff] }
 0x17d   :  { %1594 = vmatmul.mubr.f32.vlgmr.msra.gmra.mrb[16].mxu1 %v3723_v49 }
 0x17e   :  { %2091 = vmatprep.mubr.f32.mxu1 %v3674_v25 }
 0x1d0   :  { %v4282_v1 = vpop.f32.mrb[2].mxu1 }
 0x1d1   :  { %v4284_v2 = vpop.f32.mrb[3].mxu1 }
 0x1d4   :  { %v4286_v3 = vpop.f32.mrb[4].mxu1 }
 0x1d5   :  { %v4289_v4 = vpop.f32.mrb[5].mxu1 }
 0x1d8   :  { %v4292_v5 = vpop.f32.mrb[6].mxu1 }
 0x1d9   :  { %v4294_v6 = vpop.f32.mrb[7].mxu1 }
 0x1dc   :  { %v4296_v7 = vpop.f32.mrb[8].mxu1 }
 0x1dd   :  { %v4298_v8 = vpop.f32.mrb[9].mxu1 }
 0x1f0   :  { %v2832_v9 = vpop.f32.mrb[10].mxu1 }
 0x1f1   :  { %v2833_v10 = vpop.f32.mrb[11].mxu1 }
 0x1f2   :  { %v2834_v11 = vadd.f32 %v2833_v10, %v2832_v9  ;;  %v2482_v9 = vld [vmem:[%s4892_s1 + $0x450] sm:$0xff]  ;;  %v2483_v10 = vld [vmem:[%s4892_s1 + $0x458] sm:$0xff] }
 0x1f4   :  { %3136 = vmatprep.subr.mxu0 %v2834_v11 }
 0x1f5   :  { %3137 = vmatpush3.msra.mxu0 %v2834_v11  ;;  %v2500_v11 = vld [vmem:[%s4892_s1 + $0x4e0] sm:$0xff] }
 0x1f6   :  { %3139 = vmatmul.mubr.msk.f32.vlgmr.msra.gmra.mrb[2].mxu0 %vm241_vm0, %v2409_v12  ;;  %v2501_v12 = vld [vmem:[%s4892_s1 + $0x4e8] sm:$0xff] }
 0x1f7   :  { %3141 = vmatprep.mubr.msk.f32.mxu0 %vm241_vm0, %v2410_v13  ;;  %v3386_v13 = vpack.c.bf16 %v2501_v12, %v2500_v11  ;;  %v2693_v12 = vld [vmem:[%s4892_s1 + $0x8e8] sm:$0xff] }
 0x1fa   :  { %3142 = vmatmul.mubr.msk.f32.gmra.mrb[4].mxu0 %vm241_vm0, %v2411_v14  ;;  %v2484_v14 = vld [vmem:[%s4892_s1 + $0x460] sm:$0xff] }
 0x1fb   :  { %3144 = vmatprep.mubr.msk.f32.mxu0 %vm241_vm0, %v2412_v15  ;;  %v2485_v15 = vld [vmem:[%s4892_s1 + $0x468] sm:$0xff] }
 0x1fe   :  { %3145 = vmatmul.mubr.msk.f32.gmra.mrb[6].mxu0 %vm241_vm0, %v2413_v16  ;;  %v2502_v16 = vld [vmem:[%s4892_s1 + $0x4f0] sm:$0xff] }
 0x1ff   :  { %3147 = vmatprep.mubr.msk.f32.mxu0 %vm241_vm0, %v2414_v17  ;;  %v2503_v17 = vld [vmem:[%s4892_s1 + $0x4f8] sm:$0xff] }
 0x202   :  { %3148 = vmatmul.mubr.msk.f32.gmra.mrb[8].mxu0 %vm241_vm0, %v2415_v18  ;;  %v3388_v18 = vpack.c.bf16 %v2485_v15, %v2484_v14  ;;  %v2694_v15 = vld [vmem:[%s4892_s1 + $0x8f0] sm:$0xff] }
 0x203   :  { %3152 = vmatprep.mubr.msk.f32.mxu0 %vm241_vm0, %v2456_v19  ;;  %v3390_v19 = vpack.c.bf16 %v2503_v17, %v2502_v16  ;;  %v2695_v16 = vld [vmem:[%s4892_s1 + $0x8f8] sm:$0xff] }
 0x210   :  { %v2876_v22 = vpop.f32.mrb[12].mxu1 }
 0x211   :  { %v2877_v26 = vpop.f32.mrb[13].mxu1 }
 0x212   :  { %v2878_v29 = vadd.f32 %v2877_v26, %v2876_v22  ;;  %v3392_v22 = vpack.c.bf16 %v2487_v21, %v2486_v20  ;;  %v2679_v20 = vld [vmem:[%s4892_s1 + $0x878] sm:$0xff] }
 0x214   :  { %3150 = vmatprep.subr.mxu0 %v2878_v29 }
 0x215   :  { %3151 = vmatpush3.msra.mxu0 %v2878_v29 }
 0x216   :  { %3363 = vmatprep.subr.bf16.mxu0 %v3362_v30  ;;  %3153 = vmatmul.mubr.msk.f32.vlgmr.msra.gmra.mrb[2].mxu0 %vm241_vm0, %v2457_v31  ;;  %v2680_v31 = vld [vmem:[%s4892_s1 + $0x880] sm:$0xff] }
 0x217   :  { %3365 = vmatpush3.bf16.msra.mxu0 %v3364_v32  ;;  %3155 = vmatprep.mubr.msk.f32.mxu0 %vm241_vm0, %v2458_v36  ;;  %v2682_v36 = vld [vmem:[%s4892_s1 + $0x890] sm:$0xff] }
 0x218   :  { %3367 = vmatprep.subr.bf16.mxu0 %v3366_v33  ;;  %v2664_v33 = vld [vmem:[%s4892_s1 + $0x800] sm:$0xff]  ;;  %v3494_v38 = vpack.c.bf16 %v2683_v37, %v2682_v36  ;;  %v2633_v36 = vld [vmem:[%s4892_s1 + $0x788] sm:$0xff] }
 0x219   :  { %v3492_v35 = vpack.c.bf16 %v2665_v34, %v2664_v33  ;;  %v2511_v33 = vld [vmem:[%s4894_s2 + $0x138] sm:$0xff]  ;;  %v2552_v34 = vld [vmem:[%s4894_s2 + $0x140] sm:$0xff]  ;;  %v2553_v37 = vld [vmem:[%s4894_s2 + $0x148] sm:$0xff] }
 0x21a   :  { %3156 = vmatmul.mubr.msk.f32.gmra.mrb[4].mxu0 %vm241_vm0, %v2459_v40  ;;  %v2667_v40 = vld [vmem:[%s4892_s1 + $0x818] sm:$0xff] }
 0x21b   :  { %3369 = vmatpush3.bf16.msra.mxu0 %v3368_v39  ;;  %3158 = vmatprep.mubr.msk.f32.mxu0 %vm241_vm0, %v2460_v44  ;;  %v2666_v39 = vld [vmem:[%s4892_s1 + $0x810] sm:$0xff]  ;;  %v3498_v44 = vpack.c.bf16 %v2685_v43, %v2684_v42  ;;  %v2557_v42 = vld [vmem:[%s4894_s2 + $0x168] sm:$0xff] }
 0x21c   :  { %3371 = vmatprep.subr.bf16.mxu0 %v3370_v41  ;;  %v3496_v41 = vpack.c.bf16 %v2667_v40, %v2666_v39  ;;  %v2555_v40 = vld [vmem:[%s4894_s2 + $0x158] sm:$0xff]  ;;  %v2558_v43 = vld [vmem:[%s4894_s2 + $0x170] sm:$0xff] }
 0x21e   :  { %3159 = vmatmul.mubr.msk.f32.gmra.mrb[6].mxu0 %vm241_vm0, %v2461_v48  ;;  %v2686_v48 = vld [vmem:[%s4892_s1 + $0x8b0] sm:$0xff] }
 0x21f   :  { %3373 = vmatpush3.bf16.msra.mxu0 %v3372_v47  ;;  %3161 = vmatprep.mubr.msk.f32.mxu0 %vm241_vm0, %v2462_v53  ;;  %v3500_v47 = vpack.c.bf16 %v2669_v46, %v2668_v45  ;;  %v2671_v53 = vld [vmem:[%s4892_s1 + $0x838] sm:$0xff]  ;;  %v2616_v45 = vld [vmem:[%s4892_s1 + $0x700] sm:$0xff]  ;;  %v2617_v46 = vld [vmem:[%s4892_s1 + $0x708] sm:$0xff] }
 0x220   :  { %3375 = vmatprep.subr.bf16.mxu0 %v3374_v50  ;;  %v2687_v50 = vld [vmem:[%s4892_s1 + $0x8b8] sm:$0xff]  ;;  %v3504_v54 = vpack.c.bf16 %v2671_v53, %v2670_v52  ;;  %v2618_v53 = vld [vmem:[%s4892_s1 + $0x710] sm:$0xff] }
 0x221   :  { %v3502_v51 = vpack.c.bf16 %v2687_v50, %v2686_v48  ;;  %v2635_v48 = vld [vmem:[%s4892_s1 + $0x798] sm:$0xff]  ;;  %v2601_v50 = vld [vmem:[%s4894_s2 + $0x188] sm:$0xff] }
 0x222   :  { %3162 = vmatmul.mubr.msk.f32.gmra.mrb[8].mxu0 %vm241_vm0, %v2463_v57 }
 0x223   :  { %3377 = vmatpush3.bf16.msra.mxu0 %v3376_v56  ;;  %1095 = vmatprep.mubr.f32.mxu0 %v3674_v25  ;;  %v3384_v25 = vpack.c.bf16 %v2483_v10, %v2482_v9  ;;  %v2689_v56 = vld [vmem:[%s4892_s1 + $0x8c8] sm:$0xff]  ;;  %v2675_v9 = vld [vmem:[%s4892_s1 + $0x858] sm:$0xff]  ;;  %v2692_v10 = vld [vmem:[%s4892_s1 + $0x8e0] sm:$0xff] }
 0x224   :  { %3379 = vmatprep.subr.bf16.mxu0 %v3378_v58  ;;  %v3506_v57 = vpack.c.bf16 %v2689_v56, %v2688_v55  ;;  %v2672_v58 = vld [vmem:[%s4892_s1 + $0x840] sm:$0xff]  ;;  %v3514_v14 = vpack.c.bf16 %v2693_v12, %v2692_v10  ;;  %v2602_v55 = vld [vmem:[%s4894_s2 + $0x190] sm:$0xff] }
 0x225   :  { %v3508_v60 = vpack.c.bf16 %v2673_v59, %v2672_v58  ;;  %v2636_v56 = vld [vmem:[%s4892_s1 + $0x7a0] sm:$0xff]  ;;  %v2603_v59 = vld [vmem:[%s4894_s2 + $0x198] sm:$0xff] }
 0x227   :  { %3381 = vmatpush3.bf16.msra.mxu0 %v3380_v63  ;;  %v3510_v63 = vpack.c.bf16 %v2691_v62, %v2690_v61  ;;  %v2620_v61 = vld [vmem:[%s4892_s1 + $0x720] sm:$0xff]  ;;  %v2621_v62 = vld [vmem:[%s4892_s1 + $0x728] sm:$0xff] }
 0x228   :  { %3383 = vmatprep.subr.bf16.mxu0 %v3382_v0  ;;  %v2674_v0 = vld [vmem:[%s4892_s1 + $0x850] sm:$0xff]  ;;  %v3468_v10 = vpack.c.bf16 %v2621_v62, %v2620_v61  ;;  %v2651_v61 = vld [vmem:[%s4894_s2 + $0x1d8] sm:$0xff]  ;;  %v2652_v62 = vld [vmem:[%s4894_s2 + $0x1e0] sm:$0xff] }
 0x229   :  { %v3512_v11 = vpack.c.bf16 %v2675_v9, %v2674_v0  ;;  %v2638_v0 = vld [vmem:[%s4892_s1 + $0x7b0] sm:$0xff]  ;;  %v2639_v9 = vld [vmem:[%s4892_s1 + $0x7b8] sm:$0xff] }
 0x22a   :  { %v3470_v12 = vpack.c.bf16 %v2639_v9, %v2638_v0  ;;  %v2654_v0 = vld [vmem:[%s4894_s2 + $0x1f0] sm:$0xff]  ;;  %v2655_v9 = vld [vmem:[%s4894_s2 + $0x1f8] sm:$0xff] }
 0x22b   :  { %3385 = vmatpush3.bf16.msra.mxu0 %v3384_v25  ;;  %v2676_v25 = vld [vmem:[%s4892_s1 + $0x860] sm:$0xff] }
 0x22c   :  { %3387 = vmatprep.subr.bf16.mxu0 %v3386_v13  ;;  %v2677_v13 = vld [vmem:[%s4892_s1 + $0x868] sm:$0xff] }
 0x22d   :  { %v3516_v17 = vpack.c.bf16 %v2677_v13, %v2676_v25  ;;  %v2622_v25 = vld [vmem:[%s4892_s1 + $0x730] sm:$0xff]  ;;  %v2623_v13 = vld [vmem:[%s4892_s1 + $0x738] sm:$0xff] }
 0x22f   :  { %3389 = vmatpush3.bf16.msra.mxu0 %v3388_v18  ;;  %v3518_v18 = vpack.c.bf16 %v2695_v16, %v2694_v15  ;;  %v2640_v15 = vld [vmem:[%s4892_s1 + $0x7c0] sm:$0xff]  ;;  %v2641_v16 = vld [vmem:[%s4892_s1 + $0x7c8] sm:$0xff] }
 0x230   :  { %3391 = vmatprep.subr.bf16.mxu0 %v3390_v19  ;;  %v2964_v23 = vpop.f32.mrb[14].mxu1  ;;  %v2678_v19 = vld [vmem:[%s4892_s1 + $0x870] sm:$0xff] }
 0x231   :  { %v2965_v24 = vpop.f32.mrb[15].mxu1  ;;  %v3520_v21 = vpack.c.bf16 %v2679_v20, %v2678_v19  ;;  %v3474_v19 = vpack.c.bf16 %v2641_v16, %v2640_v15  ;;  %v2624_v20 = vld [vmem:[%s4892_s1 + $0x740] sm:$0xff]  ;;  %v2702_v15 = vld [vmem:[%s4894_s2 + $0x230] sm:$0xff]  ;;  %v2703_v16 = vld [vmem:[%s4894_s2 + $0x238] sm:$0xff] }
 0x232   :  { %v4458_v26 = vadd.f32 %v2965_v24, %v2964_v23 }
 0x233   :  { %3393 = vmatpush3.bf16.msra.mxu0 %v3392_v22  ;;  %v4565_v22 = vld [vmem:[%s4893_s0] sm:$0xff] }
 0x236   :  { %1096 = vmatmul.mubr.f32.vlgmr.msra.gmra.mrb[10].mxu0 %v3723_v49  ;;  %v2681_v49 = vld [vmem:[%s4892_s1 + $0x888] sm:$0xff] }
 0x237   :  { %3166 = vmatprep.mubr.msk.f32.mxu0 %vm241_vm0, %v2504_v27  ;;  %v3490_v32 = vpack.c.bf16 %v2681_v49, %v2680_v31  ;;  %v2507_v31 = vld [vmem:[%s4894_s2 + $0x118] sm:$0xff]  ;;  %v2508_v49 = vld [vmem:[%s4894_s2 + $0x120] sm:$0xff] }
 0x239   :  { %3491 = vmatprep.subr.bf16.mxu1 %v3490_v32  ;;  %v2510_v32 = vld [vmem:[%s4894_s2 + $0x130] sm:$0xff] }
 0x23a   :  { %3493 = vmatpush3.bf16.msra.mxu1 %v3492_v35  ;;  %v2632_v35 = vld [vmem:[%s4892_s1 + $0x780] sm:$0xff] }
 0x23b   :  { %3495 = vmatprep.subr.bf16.mxu1 %v3494_v38  ;;  %v2554_v38 = vld [vmem:[%s4894_s2 + $0x150] sm:$0xff]  ;;  %v3458_v39 = vpack.c.bf16 %v2633_v36, %v2632_v35  ;;  %v2628_v35 = vld [vmem:[%s4892_s1 + $0x760] sm:$0xff]  ;;  %v2629_v36 = vld [vmem:[%s4892_s1 + $0x768] sm:$0xff] }
 0x23e   :  { %3497 = vmatpush3.bf16.msra.mxu1 %v3496_v41  ;;  %v2556_v41 = vld [vmem:[%s4894_s2 + $0x160] sm:$0xff] }
 0x23f   :  { %3499 = vmatprep.subr.bf16.mxu1 %v3498_v44  ;;  %v2600_v44 = vld [vmem:[%s4894_s2 + $0x180] sm:$0xff] }
 0x242   :  { %3501 = vmatpush3.bf16.msra.mxu1 %v3500_v47  ;;  %v2634_v47 = vld [vmem:[%s4892_s1 + $0x790] sm:$0xff] }
 0x243   :  { %3503 = vmatprep.subr.bf16.mxu1 %v3502_v51  ;;  %v3460_v51 = vpack.c.bf16 %v2617_v46, %v2616_v45  ;;  %v3462_v52 = vpack.c.bf16 %v2635_v48, %v2634_v47  ;;  %v3591_v47 = vmov 0   ;;  %v2243_v48 = vld [vmem:[%s4895_s3] sm:$0xff] }
 0x244   :  { %3587 = vset.pattern.permute.xlu0 %v3591_v47  ;;  %3588 = vset.pattern.permute.xlu1 %v3591_v47 }
 0x245   :  { %2253 = vperm.xlu0 %3587, %v2243_v48  }
 0x246   :  { %3505 = vmatpush3.bf16.msra.mxu1 %v3504_v54  ;;  %v2619_v54 = vld [vmem:[%s4892_s1 + $0x718] sm:$0xff] }
 0x247   :  { %3507 = vmatprep.subr.bf16.mxu1 %v3506_v57  ;;  %v2637_v57 = vld [vmem:[%s4892_s1 + $0x7a8] sm:$0xff]  ;;  %v3464_v58 = vpack.c.bf16 %v2619_v54, %v2618_v53  ;;  %v2247_v53 = vld [vmem:[%s4895_s3 + $0x20] sm:$0xff]  ;;  %v2250_v54 = vld [vmem:[%s4895_s3 + $0x38] sm:$0xff] }
 0x24a   :  { %3509 = vmatpush3.bf16.msra.mxu1 %v3508_v60  ;;  %v3466_v60 = vpack.c.bf16 %v2637_v57, %v2636_v56 }
 0x24b   :  { %3511 = vmatprep.subr.bf16.mxu1 %v3510_v63  ;;  %v2604_v63 = vld [vmem:[%s4894_s2 + $0x1a0] sm:$0xff] }
 0x24e   :  { %3513 = vmatpush3.bf16.msra.mxu1 %v3512_v11  ;;  %v2605_v11 = vld [vmem:[%s4894_s2 + $0x1a8] sm:$0xff] }
 0x24f   :  { %3515 = vmatprep.subr.bf16.mxu1 %v3514_v14  ;;  %v2606_v14 = vld [vmem:[%s4894_s2 + $0x1b0] sm:$0xff] }
 0x250   :  { %v3008_v28 = vpop.f32.mrb[16].mxu1 }
 0x251   :  { %v3009_v29 = vpop.f32.mrb[17].mxu1 }
 0x252   :  { %v4464_v30 = vadd.f32 %v3009_v29, %v3008_v28  ;;  %3517 = vmatpush3.bf16.msra.mxu1 %v3516_v17  ;;  %v2505_v28 = vld [vmem:[%s4894_s2 + $0x108] sm:$0xff]  ;;  %v2506_v29 = vld [vmem:[%s4894_s2 + $0x110] sm:$0xff]  ;;  %v3472_v17 = vpack.c.bf16 %v2623_v13, %v2622_v25  ;;  %v2699_v25 = vld [vmem:[%s4894_s2 + $0x218] sm:$0xff] }
 0x253   :  { %3519 = vmatprep.subr.bf16.mxu1 %v3518_v18  ;;  %v2607_v18 = vld [vmem:[%s4894_s2 + $0x1b8] sm:$0xff]  ;;  %v2700_v13 = vld [vmem:[%s4894_s2 + $0x220] sm:$0xff] }
 0x256   :  { %3521 = vmatpush3.bf16.msra.mxu1 %v3520_v21  ;;  %v2625_v21 = vld [vmem:[%s4892_s1 + $0x748] sm:$0xff] }
 0x259   :  { %2092 = vmatmul.mubr.f32.vlgmr.msra.gmra.mrb[18].mxu1 %v4565_v22 }
 0x309   :  { %v2920_v23 = vpop.f32.mrb[10].mxu0 }
 0x30a   :  { %v2921_v24 = vpop.f32.mrb[11].mxu0 }
 0x30b   :  { %v2922_v27 = vadd.f32 %v2921_v24, %v2920_v23  ;;  %v2642_v23 = vld [vmem:[%s4892_s1 + $0x7d0] sm:$0xff]  ;;  %v2643_v24 = vld [vmem:[%s4892_s1 + $0x7d8] sm:$0xff] }
 0x30d   :  { %3164 = vmatprep.subr.mxu0 %v2922_v27 }
 0x30e   :  { %3165 = vmatpush3.msra.mxu0 %v2922_v27  ;;  %v3476_v27 = vpack.c.bf16 %v2625_v21, %v2624_v20 }
 0x30f   :  { %3167 = vmatmul.mubr.msk.f32.vlgmr.msra.gmra.mrb[2].mxu0 %vm241_vm0, %v2505_v28  ;;  %3178 = vmatprep.subr.mxu0 %v4458_v26  ;;  %v3590_v28 = vld [vmem:[%s4893_s0 + $0x8] sm:$0xff] }
 0x310   :  { %3179 = vmatpush3.msra.mxu0 %v4458_v26  ;;  %3169 = vmatprep.mubr.msk.f32.mxu0 %vm241_vm0, %v2506_v29  ;;  %v2509_v26 = vld [vmem:[%s4894_s2 + $0x128] sm:$0xff]  ;;  %v3478_v29 = vpack.c.bf16 %v2643_v24, %v2642_v23 }
 0x311   :  { %3192 = vmatprep.subr.mxu0 %v4464_v30 }
 0x313   :  { %3170 = vmatmul.mubr.msk.f32.gmra.mrb[4].mxu0 %vm241_vm0, %v2507_v31  ;;  %v2626_v31 = vld [vmem:[%s4892_s1 + $0x750] sm:$0xff] }
 0x314   :  { %3172 = vmatprep.mubr.msk.f32.mxu0 %vm241_vm0, %v2508_v49  ;;  %v2627_v49 = vld [vmem:[%s4892_s1 + $0x758] sm:$0xff] }
 0x317   :  { %3173 = vmatmul.mubr.msk.f32.gmra.mrb[6].mxu0 %vm241_vm0, %v2509_v26  ;;  %v2644_v26 = vld [vmem:[%s4892_s1 + $0x7e0] sm:$0xff] }
 0x318   :  { %3175 = vmatprep.mubr.msk.f32.mxu0 %vm241_vm0, %v2510_v32  ;;  %v2645_v32 = vld [vmem:[%s4892_s1 + $0x7e8] sm:$0xff] }
 0x31b   :  { %3176 = vmatmul.mubr.msk.f32.gmra.mrb[8].mxu0 %vm241_vm0, %v2511_v33  ;;  %v3480_v33 = vpack.c.bf16 %v2627_v49, %v2626_v31 }
 0x31c   :  { %3180 = vmatprep.mubr.msk.f32.mxu0 %vm241_vm0, %v2552_v34  ;;  %v3482_v34 = vpack.c.bf16 %v2645_v32, %v2644_v26 }
 0x31f   :  { %3181 = vmatmul.mubr.msk.f32.vlgmr.msra.gmra.mrb[2].mxu0 %vm241_vm0, %v2553_v37  ;;  %v2646_v37 = vld [vmem:[%s4892_s1 + $0x7f0] sm:$0xff] }
 0x320   :  { %3183 = vmatprep.mubr.msk.f32.mxu0 %vm241_vm0, %v2554_v38  ;;  %3193 = vmatpush3.msra.mxu0 %v4464_v30  ;;  %v2559_v30 = vld [vmem:[%s4894_s2 + $0x178] sm:$0xff] }
 0x321   :  { %3459 = vmatprep.subr.bf16.mxu0 %v3458_v39  ;;  %v2647_v38 = vld [vmem:[%s4892_s1 + $0x7f8] sm:$0xff]  ;;  %v3484_v39 = vpack.c.bf16 %v2629_v36, %v2628_v35 }
 0x323   :  { %3184 = vmatmul.mubr.msk.f32.gmra.mrb[4].mxu0 %vm241_vm0, %v2555_v40  ;;  %v3486_v40 = vpack.c.bf16 %v2647_v38, %v2646_v37 }
 0x324   :  { %3186 = vmatprep.mubr.msk.f32.mxu0 %vm241_vm0, %v2556_v41  ;;  %v2630_v41 = vld [vmem:[%s4892_s1 + $0x770] sm:$0xff] }
 0x327   :  { %3187 = vmatmul.mubr.msk.f32.gmra.mrb[6].mxu0 %vm241_vm0, %v2557_v42  ;;  %v2631_v42 = vld [vmem:[%s4892_s1 + $0x778] sm:$0xff] }
 0x328   :  { %3189 = vmatprep.mubr.msk.f32.mxu0 %vm241_vm0, %v2558_v43  ;;  %v3488_v43 = vpack.c.bf16 %v2631_v42, %v2630_v41 }
 0x32b   :  { %3190 = vmatmul.mubr.msk.f32.gmra.mrb[8].mxu0 %vm241_vm0, %v2559_v30  ;;  %v2648_v30 = vld [vmem:[%s4894_s2 + $0x1c0] sm:$0xff] }
 0x32c   :  { %3194 = vmatprep.mubr.msk.f32.mxu0 %vm241_vm0, %v2600_v44  ;;  %v3096_v44 = vpop.f32.mrb[18].mxu1 }
 0x32d   :  { %v3097_v45 = vpop.f32.mrb[19].mxu1 }
 0x32e   :  { %v3098_v46 = vadd.f32 %v3097_v45, %v3096_v44 }
 0x32f   :  { %3195 = vmatmul.mubr.msk.f32.vlgmr.msra.gmra.mrb[2].mxu0 %vm241_vm0, %v2601_v50  ;;  %v2244_v50 = vld [vmem:[%s4895_s3 + $0x8] sm:$0xff] }
 0x330   :  { %3461 = vmatpush3.bf16.msra.mxu0 %v3460_v51  ;;  %3197 = vmatprep.mubr.msk.f32.mxu0 %vm241_vm0, %v2602_v55  ;;  %v2246_v51 = vld [vmem:[%s4895_s3 + $0x18] sm:$0xff]  ;;  %v2249_v55 = vld [vmem:[%s4895_s3 + $0x30] sm:$0xff] }
 0x331   :  { %3463 = vmatprep.subr.bf16.mxu0 %v3462_v52  ;;  %2258 = vperm.xlu0 %3587, %v2244_v50   ;;  %v2248_v52 = vld [vmem:[%s4895_s3 + $0x28] sm:$0xff] }
 0x333   :  { %3198 = vmatmul.mubr.msk.f32.gmra.mrb[4].mxu0 %vm241_vm0, %v2603_v59  ;;  %v2649_v59 = vld [vmem:[%s4894_s2 + $0x1c8] sm:$0xff] }
 0x334   :  { %3465 = vmatpush3.bf16.msra.mxu0 %v3464_v58  ;;  %3200 = vmatprep.mubr.msk.f32.mxu0 %vm241_vm0, %v2604_v63  ;;  %v2653_v63 = vld [vmem:[%s4894_s2 + $0x1e8] sm:$0xff] }
 0x335   :  { %3467 = vmatprep.subr.bf16.mxu0 %v3466_v60  ;;  %2273 = vperm.xlu0 %3587, %v2247_v53   ;;  %v2650_v60 = vld [vmem:[%s4894_s2 + $0x1d0] sm:$0xff] }
 0x337   :  { %3201 = vmatmul.mubr.msk.f32.gmra.mrb[6].mxu0 %vm241_vm0, %v2605_v11  ;;  %v2697_v11 = vld [vmem:[%s4894_s2 + $0x208] sm:$0xff] }
 0x338   :  { %3469 = vmatpush3.bf16.msra.mxu0 %v3468_v10  ;;  %3203 = vmatprep.mubr.msk.f32.mxu0 %vm241_vm0, %v2606_v14  ;;  %v2696_v10 = vld [vmem:[%s4894_s2 + $0x200] sm:$0xff]  ;;  %v2701_v14 = vld [vmem:[%s4894_s2 + $0x228] sm:$0xff] }
 0x339   :  { %3471 = vmatprep.subr.bf16.mxu0 %v3470_v12  ;;  %2283 = vperm.xlu0 %3587, %v2249_v55   ;;  %v2698_v12 = vld [vmem:[%s4894_s2 + $0x210] sm:$0xff] }
 0x33b   :  { %3204 = vmatmul.mubr.msk.f32.gmra.mrb[8].mxu0 %vm241_vm0, %v2607_v18 }
 0x33c   :  { %3473 = vmatpush3.bf16.msra.mxu0 %v3472_v17  ;;  %1842 = vmatprep.mubr.f32.mxu0 %v3590_v28  ;;  %v2254_v17 = vpop.permute.xlu0 %2253 }
 0x33d   :  { %3475 = vmatprep.subr.bf16.mxu0 %v3474_v19 }
 0x340   :  { %3477 = vmatpush3.bf16.msra.mxu0 %v3476_v27 }
 0x341   :  { %3479 = vmatprep.subr.bf16.mxu0 %v3478_v29 }
 0x344   :  { %3481 = vmatpush3.bf16.msra.mxu0 %v3480_v33 }
 0x345   :  { %3483 = vmatprep.subr.bf16.mxu0 %v3482_v34 }
 0x348   :  { %3485 = vmatpush3.bf16.msra.mxu0 %v3484_v39 }
 0x349   :  { %3487 = vmatprep.subr.bf16.mxu0 %v3486_v40 }
 0x34c   :  { %3489 = vmatpush3.bf16.msra.mxu0 %v3488_v43 }
 0x34f   :  { %1843 = vmatmul.mubr.f32.vlgmr.msra.gmra.mrb[12].mxu0 %v4565_v22  ;;  %v2245_v22 = vld [vmem:[%s4895_s3 + $0x10] sm:$0xff] }
 0x350   :  { %3208 = vmatprep.mubr.msk.f32.mxu0 %vm241_vm0, %v2648_v30  ;;  %2263 = vperm.xlu1 %3588, %v2245_v22  }
 0x354   :  { %2268 = vperm.xlu1 %3588, %v2246_v51  }
 0x358   :  { %2278 = vperm.xlu1 %3588, %v2248_v52  }
 0x35c   :  { %2288 = vperm.xlu1 %3588, %v2250_v54  }
 0x3b0   :  { %v2259_v24 = vpop.permute.xlu0 %2258 }
 0x3b4   :  { %v2274_v39 = vpop.permute.xlu0 %2273 }
 0x3b8   :  { %v2284_v48 = vpop.permute.xlu0 %2283 }
 0x3cf   :  { %v2264_v18 = vpop.permute.xlu1 %2263 }
 0x3d3   :  { %v2269_v27 = vpop.permute.xlu1 %2268 }
 0x3d7   :  { %v2279_v36 = vpop.permute.xlu1 %2278 }
 0x422   :  { %v3052_v56 = vpop.f32.mrb[12].mxu0 }
 0x423   :  { %v3053_v57 = vpop.f32.mrb[13].mxu0 }
 0x424   :  { %v3054_v58 = vadd.f32 %v3053_v57, %v3052_v56 }
 0x426   :  { %3206 = vmatprep.subr.mxu0 %v3054_v58 }
 0x427   :  { %3207 = vmatpush3.msra.mxu0 %v3054_v58 }
 0x428   :  { %3209 = vmatmul.mubr.msk.f32.vlgmr.msra.gmra.mrb[2].mxu0 %vm241_vm0, %v2649_v59  ;;  %3220 = vmatprep.subr.mxu0 %v3098_v46 }
 0x429   :  { %3211 = vmatprep.mubr.msk.f32.mxu0 %vm241_vm0, %v2650_v60  ;;  %3221 = vmatpush3.msra.mxu0 %v3098_v46  ;;  %v2289_v46 = vpop.permute.xlu1 %2288 }
 0x42c   :  { %3212 = vmatmul.mubr.msk.f32.gmra.mrb[4].mxu0 %vm241_vm0, %v2651_v61 }
 0x42d   :  { %3214 = vmatprep.mubr.msk.f32.mxu0 %vm241_vm0, %v2652_v62 }
 0x430   :  { %3215 = vmatmul.mubr.msk.f32.gmra.mrb[6].mxu0 %vm241_vm0, %v2653_v63 }
 0x431   :  { %3217 = vmatprep.mubr.msk.f32.mxu0 %vm241_vm0, %v2654_v0 }
 0x434   :  { %3218 = vmatmul.mubr.msk.f32.gmra.mrb[8].mxu0 %vm241_vm0, %v2655_v9 }
 0x435   :  { %3222 = vmatprep.mubr.msk.f32.mxu0 %vm241_vm0, %v2696_v10 }
 0x438   :  { %3223 = vmatmul.mubr.msk.f32.vlgmr.msra.gmra.mrb[2].mxu0 %vm241_vm0, %v2697_v11 }
 0x439   :  { %3225 = vmatprep.mubr.msk.f32.mxu0 %vm241_vm0, %v2698_v12 }
 0x43c   :  { %3226 = vmatmul.mubr.msk.f32.gmra.mrb[4].mxu0 %vm241_vm0, %v2699_v25 }
 0x43d   :  { %3228 = vmatprep.mubr.msk.f32.mxu0 %vm241_vm0, %v2700_v13 }
 0x440   :  { %3229 = vmatmul.mubr.msk.f32.gmra.mrb[6].mxu0 %vm241_vm0, %v2701_v14 }
 0x441   :  { %3231 = vmatprep.mubr.msk.f32.mxu0 %vm241_vm0, %v2702_v15 }
 0x444   :  { %3232 = vmatmul.mubr.msk.f32.gmra.mrb[8].mxu0 %vm241_vm0, %v2703_v16 }
 0x50b   :  { %v3224_v19 = vpop.f32.mrb[2].mxu0 }
 0x50c   :  { %v3522_v20 = vadd.f32 %v3224_v19, %v4282_v1  ;;  %v2196_v21 = vpop.f32.mrb[3].mxu0 }
 0x50d   :  { %v3523_v23 = vadd.f32 %v2196_v21, %v4284_v2 }
 0x50e   :  { %v2292_v28 = vadd.f32 %v3522_v20, %v2259_v24 }
 0x50f   :  { %v2291_v29 = vadd.f32 %v3523_v23, %v2254_v17  ;;  %v3227_v31 = vpop.f32.mrb[4].mxu0 }
 0x510   :  { %v2300_v49 = vmax.f32 %v2292_v28, 0.0  ;;  %v3524_v26 = vadd.f32 %v3227_v31, %v4286_v3  ;;  %v2206_v32 = vpop.f32.mrb[5].mxu0 }
 0x511   :  { %v2299_v33 = vmax.f32 %v2291_v29, 0.0  ;;  %v3525_v34 = vadd.f32 %v2206_v32, %v4289_v4 }
 0x512   :  { %2309 = vst.msk [vmem:[%s4896_s4 + $0x8] sm:$0xff] %vm2307_vm1, %v2300_v49  ;;  %v2294_v1 = vadd.f32 %v3524_v26, %v2269_v27 }
 0x513   :  { %2308 = vst.msk [vmem:[%s4896_s4] sm:$0xff] %vm2307_vm1, %v2299_v33  ;;  %v2293_v2 = vadd.f32 %v3525_v34, %v2264_v18  ;;  %v3230_v35 = vpop.f32.mrb[6].mxu0 }
 0x514   :  { %v2302_v37 = vmax.f32 %v2294_v1, 0.0  ;;  %v3526_v3 = vadd.f32 %v3230_v35, %v4292_v5  ;;  %v2216_v38 = vpop.f32.mrb[7].mxu0 }
 0x515   :  { %v2301_v4 = vmax.f32 %v2293_v2, 0.0  ;;  %v3527_v40 = vadd.f32 %v2216_v38, %v4294_v6 }
 0x516   :  { %2311 = vst.msk [vmem:[%s4896_s4 + $0x18] sm:$0xff] %vm2307_vm1, %v2302_v37  ;;  %v2296_v41 = vadd.f32 %v3526_v3, %v2279_v36 }
 0x517   :  { %2310 = vst.msk [vmem:[%s4896_s4 + $0x10] sm:$0xff] %vm2307_vm1, %v2301_v4  ;;  %v2295_v42 = vadd.f32 %v3527_v40, %v2274_v39  ;;  %v3233_v43 = vpop.f32.mrb[8].mxu0 }
 0x518   :  { %v2304_v30 = vmax.f32 %v2296_v41, 0.0  ;;  %v3528_v5 = vadd.f32 %v3233_v43, %v4296_v7  ;;  %v2226_v44 = vpop.f32.mrb[9].mxu0 }
 0x519   :  { %v2303_v45 = vmax.f32 %v2295_v42, 0.0  ;;  %v3529_v6 = vadd.f32 %v2226_v44, %v4298_v8 }
 0x51a   :  { %2313 = vst.msk [vmem:[%s4896_s4 + $0x28] sm:$0xff] %vm2307_vm1, %v2304_v30  ;;  %v2298_v47 = vadd.f32 %v3528_v5, %v2289_v46 }
 0x51b   :  { %2312 = vst.msk [vmem:[%s4896_s4 + $0x20] sm:$0xff] %vm2307_vm1, %v2303_v45  ;;  %v2297_v22 = vadd.f32 %v3529_v6, %v2284_v48 }
 0x51c   :  { %v2306_v50 = vmax.f32 %v2298_v47, 0.0 }
 0x51d   :  { %v2305_v7 = vmax.f32 %v2297_v22, 0.0 }
 0x51e   :  { %2315 = vst.msk [vmem:[%s4896_s4 + $0x38] sm:$0xff] %vm2307_vm1, %v2306_v50 }
 0x51f   :  { %2314 = vst.msk [vmem:[%s4896_s4 + $0x30] sm:$0xff] %vm2307_vm1, %v2305_v7 }

</bundles_post_ra>
